<compile_context>
chip_gen: v6e
topology: v6e:2x2x1
jax: 0.10.0
libtpu: 0.0.40
codegen_flags: <defaults>
</compile_context>

<pallas_src>
import jax
import jax.numpy as jnp
from jax.experimental import pallas as pl
from jax.experimental.pallas import tpu as pltpu

HIDDEN = 512
NUM_CLASSES = 10
OUT_PAD = 128  # pad final output dim to one full lane width (lane-dense store)


def _mlp_kernel(h_ref, w1_ref, b1_ref, w2_ref, b2_ref, w3_ref, b3_ref, o_ref):
    # Linear(512, 512) + ReLU  (bf16 operands, f32 accumulate)
    x = jnp.dot(h_ref[...], w1_ref[...], preferred_element_type=jnp.float32) + b1_ref[...]
    x = jnp.maximum(x, 0.0).astype(jnp.bfloat16)
    # Linear(512, 512) + ReLU
    x = jnp.dot(x, w2_ref[...], preferred_element_type=jnp.float32) + b2_ref[...]
    x = jnp.maximum(x, 0.0).astype(jnp.bfloat16)
    # Linear(512, 10) — computed in a 128-wide padded slab, stored as bf16
    y = jnp.dot(x, w3_ref[...], preferred_element_type=jnp.float32) + b3_ref[...]
    o_ref[...] = y.astype(o_ref.dtype)


def _default_tile_b(B):
    """Pick a batch tile: multiple of 8, <=512 rows, prefer >=2 grid steps."""
    if B % 8 != 0:
        return B  # full-batch tile (block equals array dim, satisfies tiling rule)
    fallback = None
    for cand in (512, 256, 128, 64, 32, 16, 8):
        if B % cand == 0:
            if B // cand >= 2:
                return cand
            if fallback is None:
                fallback = cand
    return fallback if fallback is not None else B


def label_predictor(h, params, *, tile_b=None):
    """h: (B, 512).  params: dict from init_params (bf16 weights, f32 biases)."""
    B, D = h.shape
    assert D == HIDDEN
    if tile_b is None:
        tile_b = _default_tile_b(B)
    assert B % tile_b == 0
    assert tile_b % 8 == 0 or tile_b == B

    h_bf = h.astype(jnp.bfloat16)
    w1, b1 = params["w1"], params["b1"]
    w2, b2 = params["w2"], params["b2"]
    w3p, b3p = params["w3_pad"], params["b3_pad"]

    weight_bytes = sum(int(a.size) * a.dtype.itemsize for a in (w1, w2, w3p, b1, b2, b3p))
    io_bytes = B * (HIDDEN + OUT_PAD) * 2  # bf16 h in + bf16 padded out
    cost = pl.CostEstimate(
        flops=2 * B * HIDDEN * (HIDDEN + HIDDEN + OUT_PAD),
        transcendentals=0,
        bytes_accessed=weight_bytes + io_bytes,
    )

    out_padded = pl.pallas_call(
        _mlp_kernel,
        out_shape=jax.ShapeDtypeStruct((B, OUT_PAD), jnp.bfloat16),
        grid=(B // tile_b,),
        in_specs=[
            pl.BlockSpec((tile_b, HIDDEN), lambda i: (i, 0)),   # h tile (pipelined)
            pl.BlockSpec((HIDDEN, HIDDEN), lambda i: (0, 0)),   # w1 (grid-invariant)
            pl.BlockSpec((1, HIDDEN), lambda i: (0, 0)),        # b1
            pl.BlockSpec((HIDDEN, HIDDEN), lambda i: (0, 0)),   # w2
            pl.BlockSpec((1, HIDDEN), lambda i: (0, 0)),        # b2
            pl.BlockSpec((HIDDEN, OUT_PAD), lambda i: (0, 0)),  # w3 (padded)
            pl.BlockSpec((1, OUT_PAD), lambda i: (0, 0)),       # b3 (padded)
        ],
        out_specs=pl.BlockSpec((tile_b, OUT_PAD), lambda i: (i, 0)),
        compiler_params=pltpu.CompilerParams(
            dimension_semantics=("parallel",),
        ),
        cost_estimate=cost,
    )(h_bf, w1, b1, w2, b2, w3p, b3p)

    # Padded columns [10:128] are exactly zero (w3/b3 zero-padded); slice them off.
    return out_padded[:, :NUM_CLASSES].astype(jnp.float32)


def init_params(key):
    """PyTorch nn.Linear-style init (uniform +-1/sqrt(fan_in)); weights stored bf16,
    shaped (in_features, out_features) so the kernel computes x @ W + b."""
    k1, k2, k3, k4, k5, k6 = jax.random.split(key, 6)
    bound = 1.0 / jnp.sqrt(jnp.float32(HIDDEN))

    w1 = jax.random.uniform(k1, (HIDDEN, HIDDEN), jnp.float32, -bound, bound)
    b1 = jax.random.uniform(k2, (1, HIDDEN), jnp.float32, -bound, bound)
    w2 = jax.random.uniform(k3, (HIDDEN, HIDDEN), jnp.float32, -bound, bound)
    b2 = jax.random.uniform(k4, (1, HIDDEN), jnp.float32, -bound, bound)
    w3 = jax.random.uniform(k5, (HIDDEN, NUM_CLASSES), jnp.float32, -bound, bound)
    b3 = jax.random.uniform(k6, (1, NUM_CLASSES), jnp.float32, -bound, bound)

    # Pad the final layer to a full 128-lane width for a lane-dense output store.
    w3_pad = jnp.zeros((HIDDEN, OUT_PAD), jnp.float32).at[:, :NUM_CLASSES].set(w3)
    b3_pad = jnp.zeros((1, OUT_PAD), jnp.float32).at[:, :NUM_CLASSES].set(b3)

    return {
        "w1": w1.astype(jnp.bfloat16), "b1": b1,
        "w2": w2.astype(jnp.bfloat16), "b2": b2,
        "w3_pad": w3_pad.astype(jnp.bfloat16), "b3_pad": b3_pad,
    }


def reference_forward(h, params):
    """Pure-JAX reference that mirrors the kernel's bf16-operand / f32-accumulate math."""
    def bf(x):
        return x.astype(jnp.bfloat16).astype(jnp.float32)

    w1 = params["w1"].astype(jnp.float32)
    w2 = params["w2"].astype(jnp.float32)
    w3 = params["w3_pad"].astype(jnp.float32)

    x = jnp.maximum(bf(h) @ w1 + params["b1"], 0.0)
    x = jnp.maximum(bf(x) @ w2 + params["b2"], 0.0)
    out = bf(x) @ w3 + params["b3_pad"]
    # Kernel writes the slab in bf16; round the reference the same way.
    return bf(out)[:, :NUM_CLASSES]


if __name__ == "__main__":
    key = jax.random.PRNGKey(0)
    kp, kh = jax.random.split(key)

    params = init_params(kp)

    B = 16  # small demo batch; default tiler picks tile_b=8 -> 2 parallel grid steps
    h = jax.random.normal(kh, (B, HIDDEN), jnp.float32)

    out = label_predictor(h, params)
    out = jax.block_until_ready(out)

    ref = reference_forward(h, params)
    assert out.shape == (B, NUM_CLASSES), out.shape
    assert jnp.allclose(out, ref, atol=1e-2, rtol=1e-2), float(jnp.max(jnp.abs(out - ref)))

    print("KERNEL_OK")
</pallas_src>

<mosaic_0001>
module attributes {stable_mosaic.version = 11 : i64} {
  func.func @_mlp_kernel(%arg0: i32, %arg1: memref<8x512xbf16, #tpu.memory_space<vmem>>, %arg2: memref<512x512xbf16, #tpu.memory_space<vmem>>, %arg3: memref<1x512xf32, #tpu.memory_space<vmem>>, %arg4: memref<512x512xbf16, #tpu.memory_space<vmem>>, %arg5: memref<1x512xf32, #tpu.memory_space<vmem>>, %arg6: memref<512x128xbf16, #tpu.memory_space<vmem>>, %arg7: memref<1x128xf32, #tpu.memory_space<vmem>>, %arg8: memref<8x128xbf16, #tpu.memory_space<vmem>>) attributes {dimension_semantics = [#tpu.dimension_semantics<parallel>], iteration_bounds = array<i64: 2>, scalar_prefetch = 0 : i64, scratch_operands = 0 : i64, tpu.core_type = #tpu.core_type<tc>, window_params = [{transform_indices = @transform_0, window_bounds = array<i64: 8, 512>}, {pipeline_mode = #tpu.pipeline_mode<synchronous>, transform_indices = @transform_1, window_bounds = array<i64: 512, 512>}, {pipeline_mode = #tpu.pipeline_mode<synchronous>, transform_indices = @transform_2, window_bounds = array<i64: 1, 512>}, {pipeline_mode = #tpu.pipeline_mode<synchronous>, transform_indices = @transform_3, window_bounds = array<i64: 512, 512>}, {pipeline_mode = #tpu.pipeline_mode<synchronous>, transform_indices = @transform_4, window_bounds = array<i64: 1, 512>}, {pipeline_mode = #tpu.pipeline_mode<synchronous>, transform_indices = @transform_5, window_bounds = array<i64: 512, 128>}, {pipeline_mode = #tpu.pipeline_mode<synchronous>, transform_indices = @transform_6, window_bounds = array<i64: 1, 128>}, {transform_indices = @transform_7, window_bounds = array<i64: 8, 128>}]} {
    %c0 = arith.constant 0 : index
    %c0_0 = arith.constant 0 : index
    %0 = vector.load %arg1[%c0, %c0_0] : memref<8x512xbf16, #tpu.memory_space<vmem>>, vector<8x512xbf16>
    %c0_1 = arith.constant 0 : index
    %c0_2 = arith.constant 0 : index
    %1 = vector.load %arg2[%c0_1, %c0_2] : memref<512x512xbf16, #tpu.memory_space<vmem>>, vector<512x512xbf16>
    %cst = arith.constant dense<0.000000e+00> : vector<8x512xf32>
    %2 = tpu.matmul %0, %1, %cst {dimension_numbers = #tpu.dot_dimension_numbers<[1], [0], [0], [1], [0, 0, 1, 1], [], []>} : vector<8x512xbf16>, vector<512x512xbf16>, vector<8x512xf32> -> vector<8x512xf32>
    %c0_3 = arith.constant 0 : index
    %c0_4 = arith.constant 0 : index
    %3 = vector.load %arg3[%c0_3, %c0_4] : memref<1x512xf32, #tpu.memory_space<vmem>>, vector<1x512xf32>
    %4 = vector.broadcast %3 : vector<1x512xf32> to vector<8x512xf32>
    %5 = arith.addf %2, %4 : vector<8x512xf32>
    %cst_5 = arith.constant 0.000000e+00 : f32
    %6 = vector.broadcast %cst_5 : f32 to vector<8x512xf32>
    %7 = arith.maximumf %5, %6 : vector<8x512xf32>
    %8 = arith.truncf %7 : vector<8x512xf32> to vector<8x512xbf16>
    %c0_6 = arith.constant 0 : index
    %c0_7 = arith.constant 0 : index
    %9 = vector.load %arg4[%c0_6, %c0_7] : memref<512x512xbf16, #tpu.memory_space<vmem>>, vector<512x512xbf16>
    %cst_8 = arith.constant dense<0.000000e+00> : vector<8x512xf32>
    %10 = tpu.matmul %8, %9, %cst_8 {dimension_numbers = #tpu.dot_dimension_numbers<[1], [0], [0], [1], [0, 0, 1, 1], [], []>} : vector<8x512xbf16>, vector<512x512xbf16>, vector<8x512xf32> -> vector<8x512xf32>
    %c0_9 = arith.constant 0 : index
    %c0_10 = arith.constant 0 : index
    %11 = vector.load %arg5[%c0_9, %c0_10] : memref<1x512xf32, #tpu.memory_space<vmem>>, vector<1x512xf32>
    %12 = vector.broadcast %11 : vector<1x512xf32> to vector<8x512xf32>
    %13 = arith.addf %10, %12 : vector<8x512xf32>
    %cst_11 = arith.constant 0.000000e+00 : f32
    %14 = vector.broadcast %cst_11 : f32 to vector<8x512xf32>
    %15 = arith.maximumf %13, %14 : vector<8x512xf32>
    %16 = arith.truncf %15 : vector<8x512xf32> to vector<8x512xbf16>
    %c0_12 = arith.constant 0 : index
    %c0_13 = arith.constant 0 : index
    %17 = vector.load %arg6[%c0_12, %c0_13] : memref<512x128xbf16, #tpu.memory_space<vmem>>, vector<512x128xbf16>
    %cst_14 = arith.constant dense<0.000000e+00> : vector<8x128xf32>
    %18 = tpu.matmul %16, %17, %cst_14 {dimension_numbers = #tpu.dot_dimension_numbers<[1], [0], [0], [1], [0, 0, 1, 1], [], []>} : vector<8x512xbf16>, vector<512x128xbf16>, vector<8x128xf32> -> vector<8x128xf32>
    %c0_15 = arith.constant 0 : index
    %c0_16 = arith.constant 0 : index
    %19 = vector.load %arg7[%c0_15, %c0_16] : memref<1x128xf32, #tpu.memory_space<vmem>>, vector<1x128xf32>
    %20 = vector.broadcast %19 : vector<1x128xf32> to vector<8x128xf32>
    %21 = arith.addf %18, %20 : vector<8x128xf32>
    %22 = arith.truncf %21 : vector<8x128xf32> to vector<8x128xbf16>
    %c0_17 = arith.constant 0 : index
    %c0_18 = arith.constant 0 : index
    %23 = vector.load %arg8[%c0_17, %c0_18] : memref<8x128xbf16, #tpu.memory_space<vmem>>, vector<8x128xbf16>
    tpu.vector_store %arg8[%c0_17, %c0_18], %22 {strides = array<i32>} : memref<8x128xbf16, #tpu.memory_space<vmem>>, vector<8x128xbf16>,
    return
  }
  func.func @transform_0(%arg0: i32) -> (i32, i32) {
    %c0_i32 = arith.constant 0 : i32
    %c0_i32_0 = arith.constant 0 : i32
    return %arg0, %c0_i32 : i32, i32
  }
  func.func @transform_1(%arg0: i32) -> (i32, i32) {
    %c0_i32 = arith.constant 0 : i32
    %c0_i32_0 = arith.constant 0 : i32
    %c0_i32_1 = arith.constant 0 : i32
    return %c0_i32, %c0_i32_0 : i32, i32
  }
  func.func @transform_2(%arg0: i32) -> (i32, i32) {
    %c0_i32 = arith.constant 0 : i32
    %c0_i32_0 = arith.constant 0 : i32
    %c0_i32_1 = arith.constant 0 : i32
    return %c0_i32, %c0_i32_0 : i32, i32
  }
  func.func @transform_3(%arg0: i32) -> (i32, i32) {
    %c0_i32 = arith.constant 0 : i32
    %c0_i32_0 = arith.constant 0 : i32
    %c0_i32_1 = arith.constant 0 : i32
    return %c0_i32, %c0_i32_0 : i32, i32
  }
  func.func @transform_4(%arg0: i32) -> (i32, i32) {
    %c0_i32 = arith.constant 0 : i32
    %c0_i32_0 = arith.constant 0 : i32
    %c0_i32_1 = arith.constant 0 : i32
    return %c0_i32, %c0_i32_0 : i32, i32
  }
  func.func @transform_5(%arg0: i32) -> (i32, i32) {
    %c0_i32 = arith.constant 0 : i32
    %c0_i32_0 = arith.constant 0 : i32
    %c0_i32_1 = arith.constant 0 : i32
    return %c0_i32, %c0_i32_0 : i32, i32
  }
  func.func @transform_6(%arg0: i32) -> (i32, i32) {
    %c0_i32 = arith.constant 0 : i32
    %c0_i32_0 = arith.constant 0 : i32
    %c0_i32_1 = arith.constant 0 : i32
    return %c0_i32, %c0_i32_0 : i32, i32
  }
  func.func @transform_7(%arg0: i32) -> (i32, i32) {
    %c0_i32 = arith.constant 0 : i32
    %c0_i32_0 = arith.constant 0 : i32
    return %arg0, %c0_i32 : i32, i32
  }
}

</mosaic_0001>

<bundles_post_ra>
// kernel: tpu_custom_call.1
= control target key start
LH: loop header
LB: loop body
LE: loop exit
PB: predicated region body
PF: predicated region fallthrough
CT: control target
= control target key end

     0   :  { %s4147_s0 = inlined_call_operand.hbm [shape: bf16[16,512], index: 0, kind: input, shape index: {}]   ;;  %s4148_s1 = inlined_call_operand.hbm [shape: bf16[512,512], index: 1, kind: input, shape index: {}]   ;;  %s4149_s2 = inlined_call_operand.hbm [shape: f32[1,512], index: 2, kind: input, shape index: {}]   ;;  %s4150_s3 = inlined_call_operand.hbm [shape: bf16[512,512], index: 3, kind: input, shape index: {}]   ;;  %s4151_s4 = inlined_call_operand.vmem [shape: f32[1,512], index: 4, kind: input, shape index: {}]   ;;  %s4152_s5 = inlined_call_operand.hbm [shape: bf16[512,128], index: 5, kind: input, shape index: {}]   ;;  %s4153_s6 = inlined_call_operand.vmem [shape: f32[1,128], index: 6, kind: input, shape index: {}]   ;;  %s4154_s7 = inlined_call_operand.hbm [shape: bf16[16,128], index: 7, kind: output, shape index: {}]  }
   0x1   :  { %4159 = sst [smem:[#allocation16_spill]] %s4148_s1 }
   0x2   :  { %4160 = sst [smem:[#allocation17_spill]] %s4149_s2 }
   0x3   :  { %12 = vsyncpa [#allocation3], 0 }
   0x4   :  { %14 = vsyncpa [#allocation3 + $0x1], 0 }
   0x5   :  { %15 = vsyncpa [#allocation6], 0 }
   0x6   :  { %16 = vsyncpa [#allocation9], 0 }
   0x7   :  { %17 = vsyncpa [#allocation4], 0 }
   0x8   :  { %19 = vsyncpa [#allocation4 + $0x1], 0  ;;  %s3885_s24 = smov 0   ;;  %s3887_s25 = smov 0  }
   0x9   :  { %s3889_s26 = smov 0   ;;  %s3891_s27 = smov 0  }
   0xa LB: > { %s3835_s28 = smov [#allocation5]   ;;  %s3906_s30 = sadd.s32 4294967295, %s3833_s27   ;;  %s3833_s27 = sphi %s3891_s27, %s4182_s27   ;;  %s3829_s26 = sphi %s3889_s26, %s4181_s26   ;;  %s3825_s25 = sphi %s3887_s25, %s4180_s25   ;;  %s3821_s24 = sphi %s3885_s24, %s4179_s24  }
   0xb   : > { %s220_s29 = sshll.u32 %s3835_s28, 4  ;;  %p2760_p0 = scmp.ge.s32.totalorder %s3833_s27, 1  ;;  %s221_s29 = int_to_ptr.vmem [resolvable:$true] %s220_s29 }
   0xc   : > { %p4155_p1 = scmp.eq.s32.totalorder %s3906_s30, 0  ;;  %p208_p2 = scmp.lt.s32.totalorder %s3833_s27, 3 }
   0xd   : > { %s3836_s9 = smov [#allocation8]   ;;  %s3837_s12 = smov [#allocation7]  }
   0xe   : > { %p3911_p3 = pnand %p2760_p0, %p208_p2  ;;  %s244_s10 = sshll.u32 %s3836_s9, 4  ;;  %s3924_s10 = int_to_ptr.vmem [resolvable:$true] %s244_s10 }
   0xf   : > { %s234_s13 = sshll.u32 %s3837_s12, 4  ;;  %s3640_s14 = scalar_lea.vmem %s221_s29, 16384  ;;  %s3926_s13 = int_to_ptr.vmem [resolvable:$true] %s234_s13 }
  0x10   : > { %s4161_s8 = scalar_select %p3911_p3, 1, 0 }
  0x11   : > { %p3138_p5 = pneg %p3911_p3  ;;  %p3641_p8 = scmp.ne.s32.totalorder %s221_s29, %s3640_s14 }
  0x12   : > { %p3648_p11 = scmp.lt.s32.totalorder %s221_s29, %s221_s29  ;;  %p3649_p12 = scmp.lt.s32.totalorder %s3640_s14, %s3640_s14 }
  0x13   : > { %p3920_p6 = pnand %p3138_p5, %p4155_p1 }
  0x14   : > { %p3650_p13 = por %p3649_p12, %p3648_p11 }
  0x15   : > { %p3631_p7 = pneg %p3920_p6 }
  0x17   : > { %p3643_p9 = pnand %p3641_p8, %p3631_p7 }
  0x19   : > { %p3644_p10 = pneg %p3643_p9 }
  0x1b   : > { %p3651_p0 = pnand %p3650_p13, %p3644_p10 }
  0x1d   : > { %3654 = shalt.err (!%p3651_p0)
}
  0x1e   : > { %s3838_s15 = smov 256   ;;  %s3839_s16 = smov 16  }
  0x1f   : > { %s4163_s1 = sld [smem:[#allocation16_spill]]  ;;  %s3666_s19 = scalar_lea.vmem %s3924_s10, 16384 }
  0x20   : > { %p3667_p2 = scmp.ne.s32.totalorder %s3924_s10, %s3666_s19  ;;  %p3674_p9 = scmp.lt.s32.totalorder %s3924_s10, %s3924_s10 }
  0x21   : > { %p3675_p10 = scmp.lt.s32.totalorder %s3666_s19, %s3666_s19 }
  0x22   : > { %p3669_p5 = pnand %p3667_p2, %p3631_p7 }
  0x23   : > { %p3676_p11 = por %p3675_p10, %p3674_p9 }
  0x24   : > { %p3670_p8 = pneg %p3669_p5 }
  0x25   : > { %3141 = dma.hbm_to_vmem [thread:$0]  (!%p3920_p6), %s4163_s1, 16384, %s221_s29, [#allocation6], %s3838_s15, %s3838_s15, %s3839_s16  }
  0x26   : > { %p3677_p12 = pnand %p3676_p11, %p3670_p8 }
  0x28   : > { %3680 = shalt.err (!%p3677_p12)
}
  0x29   : > { %3147 = dma.hbm_to_vmem [thread:$0]  (!%p3920_p6), %s4150_s3, 16384, %s3924_s10, [#allocation9], %s3838_s15, %s3838_s15, %s3839_s16  }
  0x2a   : > { %s3692_s22 = scalar_lea.vmem %s3926_s13, 64  ;;  %p3700_p5 = scmp.lt.s32.totalorder %s3926_s13, %s3926_s13 }
  0x2b   : > { %p3693_p13 = scmp.ne.s32.totalorder %s3926_s13, %s3692_s22  ;;  %p3701_p8 = scmp.lt.s32.totalorder %s3692_s22, %s3692_s22 }
  0x2d   : > { %p3695_p0 = pnand %p3693_p13, %p3631_p7  ;;  %p3702_p9 = por %p3701_p8, %p3700_p5 }
  0x2f   : > { %p3696_p2 = pneg %p3695_p0 }
  0x31   : > { %p3703_p10 = pnand %p3702_p9, %p3696_p2 }
  0x33   : > { %3706 = shalt.err (!%p3703_p10)
}
  0x34   : > { %s4164_s2 = sld [smem:[#allocation17_spill]]  ;;  %s3840_s29 = smov [#allocation10]  }
  0x35   : > { %s260_s9 = sshll.u32 %s3840_s29, 4  ;;  %s261_s9 = int_to_ptr.vmem [resolvable:$true] %s260_s9 }
  0x36   : > { %s3718_s10 = scalar_lea.vmem %s261_s9, 4096  ;;  %p3726_p0 = scmp.lt.s32.totalorder %s261_s9, %s261_s9 }
  0x37   : > { %p3719_p11 = scmp.ne.s32.totalorder %s261_s9, %s3718_s10  ;;  %p3727_p2 = scmp.lt.s32.totalorder %s3718_s10, %s3718_s10 }
  0x39   : > { %p3721_p12 = pnand %p3719_p11, %p3631_p7  ;;  %p3728_p5 = por %p3727_p2, %p3726_p0 }
  0x3a   : > { %3144 = dma.hbm_to_vmem [thread:$0]  (!%p3920_p6), %s4164_s2, 64, %s3926_s13, [#allocation6]  }
  0x3b   : > { %p3722_p13 = pneg %p3721_p12 }
  0x3d   : > { %p3729_p8 = pnand %p3728_p5, %p3722_p13 }
  0x3f   : > { %3732 = shalt.err (!%p3729_p8)
}
  0x40   : > { %s3841_s12 = smov 64   ;;  %s3842_s13 = smov 4  }
  0x41   : > { %3150 = dma.hbm_to_vmem [thread:$0]  (!%p3920_p6), %s4152_s5, 4096, %s261_s9, [#allocation9], %s3841_s12, %s3841_s12, %s3842_s13  }
  0x42   : > { %s2759_s16 = sadd.s32 4294967294, %s3833_s27   ;;  %s3974_s17 = sadd.s32 1, %s3833_s27  }
  0x43   : > { %s29_s18 = ssub.s32 %s3833_s27, %s3974_s17  ;;  %s32_s19 = sadd.s32 1, %s3829_s26 }
  0x44   : > { %p30_p7 = scmp.eq.s32.totalorder %s29_s18, 0  ;;  %p39_p9 = scmp.ne.s32.totalorder %s3829_s26, %s3825_s25 }
  0x45   : > { %p40_p10 = scmp.eq.s32.totalorder %s3833_s27, 0  ;;  %p45_p11 = scmp.ne.s32.totalorder %s3825_s25, %s3821_s24 }
  0x46   : > { %s3985_s20 = scalar_select %p30_p7, %s3829_s26, %s32_s19  }
  0x47   : > { %p3987_p12 = por %p40_p10, %p39_p9  ;;  %p3993_p6 = por %p4155_p1, %p45_p11 }
  0x48   : > { %p195_p13 = scmp.eq.s32.totalorder %s3906_s30, 1  ;;  %p201_p0 = scmp.eq.s32.totalorder %s2759_s16, 1 }
  0x49   : > { %s4166_s21 = scalar_select %p3993_p6, 1, 0 }
  0x4a   : > { %p3163_p2 = scmp.lt.s32.totalorder %s3833_s27, 2  ;;  %s277_s22 = sand.u32 1, %s3829_s26  }
  0x4b   : > { %p4000_p5 = por %p195_p13, %p39_p9  ;;  %p4004_p8 = por %p201_p0, %p45_p11 }
  0x4c   : > { %s2766_s29 = sshll.u32 %s277_s22, 4  ;;  %s3073_s9 = sshll.u32 %s3833_s27, 8 }
  0x4d   : > { %s4167_s23 = scalar_select %p4000_p5, 1, 0 }
  0x4e   : > { %s4168_s28 = scalar_select %p4004_p8, 1, 0 }
  0x4f   : > { %s4012_s13 = scalar_lea.hbm %s4147_s0, %s3073_s9  ;;  %s281_s14 = scalar_lea.vmem [#allocation2], %s2766_s29 }
  0x50   : > { %s289_s15 = sshll.u32 %s281_s14, 4  ;;  %p4016_p7 = pnand %p3163_p2, %p3987_p12  ;;  %s290_s15 = int_to_ptr.vmem [resolvable:$true] %s289_s15 }
  0x51   : > { %s278_s18 = scalar_lea.sflag [#allocation3], %s277_s22  ;;  %s3733_s19 = scalar_lea.hbm %s4012_s13, 256 }
  0x52   : > { %p3734_p9 = scmp.ne.s32.totalorder %s4012_s13, %s3733_s19  ;;  %p3735_p10 = pneg %p4016_p7 }
  0x53   : > { %s3738_s12 = scalar_lea.hbm %s4147_s0, 512  ;;  %p3739_p0 = scmp.lt.s32.totalorder %s4012_s13, %s4147_s0 }
  0x54   : > { %p3736_p11 = pnand %p3735_p10, %p3734_p9  ;;  %p3740_p12 = scmp.lt.s32.totalorder %s3738_s12, %s3733_s19 }
  0x56   : > { %p3737_p13 = pneg %p3736_p11  ;;  %p3741_p2 = por %p3740_p12, %p3739_p0 }
  0x58   : > { %p3742_p4 = pnand %p3741_p2, %p3737_p13 }
  0x5a   : > { %3745 = shalt.err (!%p3742_p4)
}
  0x5b   : > { %s3746_s11 = scalar_lea.vmem %s290_s15, 256  ;;  %s3843_s22 = smov [#allocation2]  }
  0x5c   : > { %p3747_p1 = scmp.ne.s32.totalorder %s290_s15, %s3746_s11  ;;  %s3751_s1 = sshll.u32 %s3843_s22, 4  ;;  %s3752_s1 = int_to_ptr.vmem [resolvable:$false] %s3751_s1 }
  0x5d   : > { %s3753_s2 = scalar_lea.vmem %s3752_s1, 512  ;;  %p3754_p9 = scmp.lt.s32.totalorder %s290_s15, %s3752_s1 }
  0x5e   : > { %p3749_p8 = pnand %p3747_p1, %p3735_p10  ;;  %p3755_p11 = scmp.lt.s32.totalorder %s3753_s2, %s3746_s11 }
  0x60   : > { %p3750_p5 = pneg %p3749_p8  ;;  %p3756_p6 = por %p3755_p11, %p3754_p9 }
  0x62   : > { %p3757_p3 = pnand %p3756_p6, %p3750_p5 }
  0x64   : > { %3760 = shalt.err (!%p3757_p3)
}
  0x65   : > { %3154 = dma.hbm_to_vmem [thread:$0]  (!%p4016_p7), %s4012_s13, 256, %s290_s15, %s278_s18  }
  0x66   : > { %p4170_p13 = scmp.ne.s32.totalorder %s4161_s8, 0 }
  0x67   : > { %s4037_s19 = sand.u32 (!%p4170_p13), 1, %s3825_s25   ;;  %p4171_p1 = scmp.ne.s32.totalorder (!%p4170_p13), %s4166_s21, 0 }
  0x68   : > { %298 = sbr.rel (%p4170_p13) target bundleno = 929 (0x3a1), region = 48  ;;  %s2770_s9 = sshll.u32 (!%p4170_p13), %s4037_s19, 4 }
  0x69   : > { %s301_s10 = scalar_lea.sflag (!%p4170_p13), [#allocation3], %s4037_s19  ;;  %s4041_s1 = scalar_lea.vmem (!%p4170_p13), [#allocation2], %s2770_s9 }
  0x6d   : > { %3804 = dma.done.wait (%p4171_p1), %s301_s10, 256  }
  0x6e   : > { %3806 = vsyncadd (%p4171_p1), %s301_s10, 4294967040  ;;  %p4172_p3 = scmp.eq.s32.totalorder %s3906_s30, 0 }
  0x70   : > { %3808 = dma.done.wait (%p4172_p3), [#allocation6], 16448   ;;  %p4173_p4 = pmov %p4172_p3 }
  0x71   : > { %p4174_p6 = pmov %p4172_p3 }
  0x72   : > { %3810 = vsyncadd (%p4173_p4), [#allocation6], 4294950848 }
  0x73   : > { %3812 = dma.done.wait (%p4174_p6), [#allocation9], 20480   ;;  %p4175_p5 = pmov %p4172_p3 }
  0x74   : > { %v3209_v0 = vld [vmem:[#allocation5 + $0xe4] ss:$16 sps:$4 sm:$0xff]   ;;  %v3213_v2 = vld [vmem:[#allocation5 + $0xe0] ss:$16 sps:$4 sm:$0xff]   ;;  %v353_v48 = vld [vmem:[%s4041_s1 + $0x8] sm:$0xff]  ;;  %s2775_s21 = sshll.u32 %s4037_s19, 2 }
  0x75   : > { %3814 = vsyncadd (%p4175_p5), [#allocation9], 4294946816  ;;  %v3211_v1 = vld [vmem:[#allocation5 + $0x2e4] ss:$16 sps:$4 sm:$0xff]   ;;  %1158 = vmatprep.subr.bf16.mxu0 %v3209_v0  ;;  %v3214_v3 = vld [vmem:[#allocation5 + $0x2e0] ss:$16 sps:$4 sm:$0xff]   ;;  %v2779_v51 = vcombine.high %v353_v48, %v353_v48 }
  0x76   : > { %1199 = vmatprep.subr.bf16.mxu1 %v3211_v1  ;;  %v3215_v4 = vld [vmem:[#allocation5 + $0xc4] ss:$16 sps:$4 sm:$0xff]   ;;  %1159 = vmatpush1.bf16.msra.mxu0 %v3213_v2  ;;  %v3219_v6 = vld [vmem:[#allocation5 + $0xc0] ss:$16 sps:$4 sm:$0xff]   ;;  %s3070_s16 = sshll.u32 %s3906_s30, 6  ;;  %s350_s18 = scalar_lea.vmem [#allocation11], %s2775_s21 }
  0x77   : > { %1200 = vmatpush1.bf16.msra.mxu1 %v3214_v3  ;;  %v3217_v5 = vld [vmem:[#allocation5 + $0x2c4] ss:$16 sps:$4 sm:$0xff]   ;;  %1160 = vmatprep.subr.bf16.mxu0 %v3215_v4  ;;  %v3220_v7 = vld [vmem:[#allocation5 + $0x2c0] ss:$16 sps:$4 sm:$0xff]   ;;  %v3311_v4 = vld [vmem:[#allocation5 + $0xec] ss:$16 sps:$4 sm:$0xff]   ;;  %s2649_s11 = scalar_lea.hbm %s4154_s7, %s3070_s16 }
  0x78   : > { %1201 = vmatprep.subr.bf16.mxu1 %v3217_v5  ;;  %v3221_v8 = vld [vmem:[#allocation5 + $0xa4] ss:$16 sps:$4 sm:$0xff]   ;;  %v3225_v10 = vld [vmem:[#allocation5 + $0xa0] ss:$16 sps:$4 sm:$0xff]   ;;  %1231 = vmatprep.mubr.bf16.mxu1 %v2779_v51  ;;  %v3314_v5 = vld [vmem:[#allocation5 + $0x2ec] ss:$16 sps:$4 sm:$0xff]  }
  0x79   : > { %v3223_v9 = vld [vmem:[#allocation5 + $0x2a4] ss:$16 sps:$4 sm:$0xff]   ;;  %v3226_v11 = vld [vmem:[#allocation5 + $0x2a0] ss:$16 sps:$4 sm:$0xff]   ;;  %s2651_s12 = sshll.u32 %s350_s18, 4  ;;  %s2638_s22 = scalar_lea.sflag [#allocation4], %s4037_s19  ;;  %s2652_s12 = int_to_ptr.vmem [resolvable:$true] %s2651_s12 }
  0x7a   : > { %1161 = vmatpush1.bf16.msra.mxu0 %v3219_v6  ;;  %v3227_v12 = vld [vmem:[#allocation5 + $0x84] ss:$16 sps:$4 sm:$0xff]   ;;  %v3231_v14 = vld [vmem:[#allocation5 + $0x80] ss:$16 sps:$4 sm:$0xff]   ;;  %s3761_s9 = scalar_lea.vmem %s2652_s12, 64  ;;  %p4176_p7 = scmp.ne.s32.totalorder %s4167_s23, 0 }
  0x7b   : > { %1202 = vmatpush1.bf16.msra.mxu1 %v3220_v7  ;;  %1162 = vmatprep.subr.bf16.mxu0 %v3221_v8  ;;  %v3229_v13 = vld [vmem:[#allocation5 + $0x284] ss:$16 sps:$4 sm:$0xff]   ;;  %v3232_v15 = vld [vmem:[#allocation5 + $0x280] ss:$16 sps:$4 sm:$0xff]   ;;  %v4062_v7 = vcombine.low %v353_v48, %v353_v48  ;;  %v3309_v8 = vld [vmem:[#allocation5 + $0xe8] ss:$16 sps:$4 sm:$0xff]   ;;  %p3762_p8 = scmp.ne.s32.totalorder %s2652_s12, %s3761_s9 }
  0x7c   : > { %1203 = vmatprep.subr.bf16.mxu1 %v3223_v9  ;;  %v3233_v16 = vld [vmem:[#allocation5 + $0x64] ss:$16 sps:$4 sm:$0xff]   ;;  %v3237_v18 = vld [vmem:[#allocation5 + $0x60] ss:$16 sps:$4 sm:$0xff]   ;;  %v3312_v9 = vld [vmem:[#allocation5 + $0x2e8] ss:$16 sps:$4 sm:$0xff]  }
  0x7d   : > { %v3235_v17 = vld [vmem:[#allocation5 + $0x264] ss:$16 sps:$4 sm:$0xff]   ;;  %v3238_v19 = vld [vmem:[#allocation5 + $0x260] ss:$16 sps:$4 sm:$0xff]   ;;  %v3369_v48 = vld [vmem:[#allocation5 + $0x1a8] ss:$16 sps:$4 sm:$0xff]   ;;  %p3763_p10 = pnand %p3762_p8, %p4176_p7 }
  0x7e   : > { %1163 = vmatpush1.bf16.msra.mxu0 %v3225_v10  ;;  %v3239_v20 = vld [vmem:[#allocation5 + $0x44] ss:$16 sps:$4 sm:$0xff]   ;;  %v3243_v22 = vld [vmem:[#allocation5 + $0x40] ss:$16 sps:$4 sm:$0xff]   ;;  %v3317_v10 = vld [vmem:[#allocation5 + $0xcc] ss:$16 sps:$4 sm:$0xff]  }
  0x7f   : > { %1204 = vmatpush1.bf16.msra.mxu1 %v3226_v11  ;;  %1164 = vmatprep.subr.bf16.mxu0 %v3227_v12  ;;  %v3241_v21 = vld [vmem:[#allocation5 + $0x244] ss:$16 sps:$4 sm:$0xff]   ;;  %v3244_v23 = vld [vmem:[#allocation5 + $0x240] ss:$16 sps:$4 sm:$0xff]   ;;  %v3320_v11 = vld [vmem:[#allocation5 + $0x2cc] ss:$16 sps:$4 sm:$0xff]   ;;  %p3764_p0 = pneg %p3763_p10 }
  0x80   : > { %1205 = vmatprep.subr.bf16.mxu1 %v3229_v13  ;;  %v3245_v24 = vld [vmem:[#allocation5 + $0x24] ss:$16 sps:$4 sm:$0xff]   ;;  %v3249_v26 = vld [vmem:[#allocation5 + $0x20] ss:$16 sps:$4 sm:$0xff]   ;;  %v3315_v12 = vld [vmem:[#allocation5 + $0xc8] ss:$16 sps:$4 sm:$0xff]  }
  0x81   : > { %v3247_v25 = vld [vmem:[#allocation5 + $0x224] ss:$16 sps:$4 sm:$0xff]   ;;  %v3250_v27 = vld [vmem:[#allocation5 + $0x220] ss:$16 sps:$4 sm:$0xff]   ;;  %v3318_v13 = vld [vmem:[#allocation5 + $0x2c8] ss:$16 sps:$4 sm:$0xff]  }
  0x82   : > { %1165 = vmatpush1.bf16.msra.mxu0 %v3231_v14  ;;  %v3251_v28 = vld [vmem:[#allocation5 + $0x4] ss:$16 sps:$4 sm:$0xff]   ;;  %v3255_v30 = vld [vmem:[#allocation5] ss:$16 sps:$4 sm:$0xff]   ;;  %v3323_v14 = vld [vmem:[#allocation5 + $0xac] ss:$16 sps:$4 sm:$0xff]  }
  0x83   : > { %1206 = vmatpush1.bf16.msra.mxu1 %v3232_v15  ;;  %1166 = vmatprep.subr.bf16.mxu0 %v3233_v16  ;;  %v3253_v29 = vld [vmem:[#allocation5 + $0x204] ss:$16 sps:$4 sm:$0xff]   ;;  %v3256_v31 = vld [vmem:[#allocation5 + $0x200] ss:$16 sps:$4 sm:$0xff]   ;;  %v3326_v15 = vld [vmem:[#allocation5 + $0x2ac] ss:$16 sps:$4 sm:$0xff]  }
  0x84   : > { %1207 = vmatprep.subr.bf16.mxu1 %v3235_v17  ;;  %v3257_v32 = vld [vmem:[#allocation5 + $0x1e4] ss:$16 sps:$4 sm:$0xff]   ;;  %v3261_v34 = vld [vmem:[#allocation5 + $0x1e0] ss:$16 sps:$4 sm:$0xff]   ;;  %v3321_v16 = vld [vmem:[#allocation5 + $0xa8] ss:$16 sps:$4 sm:$0xff]  }
  0x85   : > { %v3259_v33 = vld [vmem:[#allocation5 + $0x3e4] ss:$16 sps:$4 sm:$0xff]   ;;  %v3262_v35 = vld [vmem:[#allocation5 + $0x3e0] ss:$16 sps:$4 sm:$0xff]   ;;  %v3324_v17 = vld [vmem:[#allocation5 + $0x2a8] ss:$16 sps:$4 sm:$0xff]  }
  0x86   : > { %1167 = vmatpush1.bf16.msra.mxu0 %v3237_v18  ;;  %v3263_v36 = vld [vmem:[#allocation5 + $0x1c4] ss:$16 sps:$4 sm:$0xff]   ;;  %v3267_v38 = vld [vmem:[#allocation5 + $0x1c0] ss:$16 sps:$4 sm:$0xff]   ;;  %v3329_v18 = vld [vmem:[#allocation5 + $0x8c] ss:$16 sps:$4 sm:$0xff]  }
  0x87   : > { %1208 = vmatpush1.bf16.msra.mxu1 %v3238_v19  ;;  %1168 = vmatprep.subr.bf16.mxu0 %v3239_v20  ;;  %v3265_v37 = vld [vmem:[#allocation5 + $0x3c4] ss:$16 sps:$4 sm:$0xff]   ;;  %v3268_v39 = vld [vmem:[#allocation5 + $0x3c0] ss:$16 sps:$4 sm:$0xff]   ;;  %v3332_v19 = vld [vmem:[#allocation5 + $0x28c] ss:$16 sps:$4 sm:$0xff]  }
  0x88   : > { %1209 = vmatprep.subr.bf16.mxu1 %v3241_v21  ;;  %v3269_v40 = vld [vmem:[#allocation5 + $0x1a4] ss:$16 sps:$4 sm:$0xff]   ;;  %v3273_v42 = vld [vmem:[#allocation5 + $0x1a0] ss:$16 sps:$4 sm:$0xff]   ;;  %v3327_v20 = vld [vmem:[#allocation5 + $0x88] ss:$16 sps:$4 sm:$0xff]  }
  0x89   : > { %v3271_v41 = vld [vmem:[#allocation5 + $0x3a4] ss:$16 sps:$4 sm:$0xff]   ;;  %v3274_v43 = vld [vmem:[#allocation5 + $0x3a0] ss:$16 sps:$4 sm:$0xff]   ;;  %v3330_v21 = vld [vmem:[#allocation5 + $0x288] ss:$16 sps:$4 sm:$0xff]  }
  0x8a   : > { %1169 = vmatpush1.bf16.msra.mxu0 %v3243_v22  ;;  %v3275_v44 = vld [vmem:[#allocation5 + $0x184] ss:$16 sps:$4 sm:$0xff]   ;;  %v3279_v49 = vld [vmem:[#allocation5 + $0x180] ss:$16 sps:$4 sm:$0xff]   ;;  %v3335_v22 = vld [vmem:[#allocation5 + $0x6c] ss:$16 sps:$4 sm:$0xff]  }
  0x8b   : > { %1210 = vmatpush1.bf16.msra.mxu1 %v3244_v23  ;;  %1170 = vmatprep.subr.bf16.mxu0 %v3245_v24  ;;  %v3277_v45 = vld [vmem:[#allocation5 + $0x384] ss:$16 sps:$4 sm:$0xff]   ;;  %v3280_v50 = vld [vmem:[#allocation5 + $0x380] ss:$16 sps:$4 sm:$0xff]   ;;  %v3338_v23 = vld [vmem:[#allocation5 + $0x26c] ss:$16 sps:$4 sm:$0xff]  }
  0x8c   : > { %1211 = vmatprep.subr.bf16.mxu1 %v3247_v25  ;;  %v352_v46 = vld [vmem:[%s4041_s1] sm:$0xff]  ;;  %v3333_v24 = vld [vmem:[#allocation5 + $0x68] ss:$16 sps:$4 sm:$0xff]   ;;  %s3844_s10 = smov [#allocation11]  }
  0x8d   : > { %v4056_v47 = vcombine.high %v352_v46, %v352_v46  ;;  %v3281_v52 = vld [vmem:[#allocation5 + $0x164] ss:$16 sps:$4 sm:$0xff]   ;;  %v3285_v54 = vld [vmem:[#allocation5 + $0x160] ss:$16 sps:$4 sm:$0xff]   ;;  %v4060_v6 = vcombine.low %v352_v46, %v352_v46  ;;  %v3336_v25 = vld [vmem:[#allocation5 + $0x268] ss:$16 sps:$4 sm:$0xff]  }
  0x8e   : > { %1171 = vmatpush1.bf16.msra.mxu0 %v3249_v26  ;;  %v3283_v53 = vld [vmem:[#allocation5 + $0x364] ss:$16 sps:$4 sm:$0xff]   ;;  %v3286_v55 = vld [vmem:[#allocation5 + $0x360] ss:$16 sps:$4 sm:$0xff]   ;;  %v3341_v26 = vld [vmem:[#allocation5 + $0x4c] ss:$16 sps:$4 sm:$0xff]  }
  0x8f   : > { %1212 = vmatpush1.bf16.msra.mxu1 %v3250_v27  ;;  %1172 = vmatprep.subr.bf16.mxu0 %v3251_v28  ;;  %v3287_v56 = vld [vmem:[#allocation5 + $0x144] ss:$16 sps:$4 sm:$0xff]   ;;  %v3291_v58 = vld [vmem:[#allocation5 + $0x140] ss:$16 sps:$4 sm:$0xff]   ;;  %v3344_v27 = vld [vmem:[#allocation5 + $0x24c] ss:$16 sps:$4 sm:$0xff]  }
  0x90   : > { %1213 = vmatprep.subr.bf16.mxu1 %v3253_v29  ;;  %1190 = vmatprep.mubr.bf16.mxu0 %v4056_v47  ;;  %v3289_v57 = vld [vmem:[#allocation5 + $0x344] ss:$16 sps:$4 sm:$0xff]   ;;  %v3292_v59 = vld [vmem:[#allocation5 + $0x340] ss:$16 sps:$4 sm:$0xff]   ;;  %v3339_v28 = vld [vmem:[#allocation5 + $0x48] ss:$16 sps:$4 sm:$0xff]  }
  0x91   : > { %v3293_v60 = vld [vmem:[#allocation5 + $0x124] ss:$16 sps:$4 sm:$0xff]   ;;  %v3297_v62 = vld [vmem:[#allocation5 + $0x120] ss:$16 sps:$4 sm:$0xff]   ;;  %v3342_v29 = vld [vmem:[#allocation5 + $0x248] ss:$16 sps:$4 sm:$0xff]  }
  0x92   : > { %1173 = vmatpush1.bf16.msra.mxu0 %v3255_v30  ;;  %v3295_v61 = vld [vmem:[#allocation5 + $0x324] ss:$16 sps:$4 sm:$0xff]   ;;  %v3298_v63 = vld [vmem:[#allocation5 + $0x320] ss:$16 sps:$4 sm:$0xff]   ;;  %v3347_v30 = vld [vmem:[#allocation5 + $0x2c] ss:$16 sps:$4 sm:$0xff]  }
  0x93   : > { %1214 = vmatpush1.bf16.msra.mxu1 %v3256_v31  ;;  %1174 = vmatprep.subr.bf16.mxu0 %v3257_v32  ;;  %v3299_v0 = vld [vmem:[#allocation5 + $0x104] ss:$16 sps:$4 sm:$0xff]   ;;  %v3303_v2 = vld [vmem:[#allocation5 + $0x100] ss:$16 sps:$4 sm:$0xff]   ;;  %v3350_v31 = vld [vmem:[#allocation5 + $0x22c] ss:$16 sps:$4 sm:$0xff]  }
  0x94   : > { %1215 = vmatprep.subr.bf16.mxu1 %v3259_v33  ;;  %v3301_v1 = vld [vmem:[#allocation5 + $0x304] ss:$16 sps:$4 sm:$0xff]   ;;  %v3304_v3 = vld [vmem:[#allocation5 + $0x300] ss:$16 sps:$4 sm:$0xff]   ;;  %v3345_v32 = vld [vmem:[#allocation5 + $0x28] ss:$16 sps:$4 sm:$0xff]  }
  0x95   : > { %v3348_v33 = vld [vmem:[#allocation5 + $0x228] ss:$16 sps:$4 sm:$0xff]   ;;  %v3371_v46 = vld [vmem:[#allocation5 + $0x1ac] ss:$16 sps:$4 sm:$0xff]   ;;  %s3765_s1 = sshll.u32 %s3844_s10, 4  ;;  %s3766_s1 = int_to_ptr.vmem [resolvable:$false] %s3765_s1 }
  0x96   : > { %1175 = vmatpush2.bf16.msra.mxu0 %v3261_v34  ;;  %v3353_v34 = vld [vmem:[#allocation5 + $0xc] ss:$16 sps:$4 sm:$0xff]   ;;  %s3767_s30 = scalar_lea.vmem %s3766_s1, 128  ;;  %p3768_p12 = scmp.lt.s32.totalorder %s2652_s12, %s3766_s1 }
  0x97   : > { %1216 = vmatpush2.bf16.msra.mxu1 %v3262_v35  ;;  %1176 = vmatprep.subr.bf16.mxu0 %v3263_v36  ;;  %v3356_v35 = vld [vmem:[#allocation5 + $0x20c] ss:$16 sps:$4 sm:$0xff]   ;;  %v3351_v36 = vld [vmem:[#allocation5 + $0x8] ss:$16 sps:$4 sm:$0xff]   ;;  %p3769_p2 = scmp.lt.s32.totalorder %s3767_s30, %s3761_s9 }
  0x98   : > { %1217 = vmatprep.subr.bf16.mxu1 %v3265_v37  ;;  %v3354_v37 = vld [vmem:[#allocation5 + $0x208] ss:$16 sps:$4 sm:$0xff]  }
  0x99   : > { %p3770_p9 = por %p3769_p2, %p3768_p12 }
  0x9a   : > { %1177 = vmatpush2.bf16.msra.mxu0 %v3267_v38  ;;  %v3359_v38 = vld [vmem:[#allocation5 + $0x1ec] ss:$16 sps:$4 sm:$0xff]  }
  0x9b   : > { %1218 = vmatpush2.bf16.msra.mxu1 %v3268_v39  ;;  %1178 = vmatprep.subr.bf16.mxu0 %v3269_v40  ;;  %v3362_v39 = vld [vmem:[#allocation5 + $0x3ec] ss:$16 sps:$4 sm:$0xff]   ;;  %v3357_v40 = vld [vmem:[#allocation5 + $0x1e8] ss:$16 sps:$4 sm:$0xff]   ;;  %p3771_p11 = pnand %p3770_p9, %p3764_p0 }
  0x9c   : > { %1219 = vmatprep.subr.bf16.mxu1 %v3271_v41  ;;  %v3360_v41 = vld [vmem:[#allocation5 + $0x3e8] ss:$16 sps:$4 sm:$0xff]  }
  0x9e   : > { %1179 = vmatpush2.bf16.msra.mxu0 %v3273_v42  ;;  %v3365_v42 = vld [vmem:[#allocation5 + $0x1cc] ss:$16 sps:$4 sm:$0xff]  }
  0x9f   : > { %1220 = vmatpush2.bf16.msra.mxu1 %v3274_v43  ;;  %1180 = vmatprep.subr.bf16.mxu0 %v3275_v44  ;;  %v3368_v43 = vld [vmem:[#allocation5 + $0x3cc] ss:$16 sps:$4 sm:$0xff]   ;;  %v3363_v44 = vld [vmem:[#allocation5 + $0x1c8] ss:$16 sps:$4 sm:$0xff]  }
  0xa0   : > { %1221 = vmatprep.subr.bf16.mxu1 %v3277_v45  ;;  %v3366_v45 = vld [vmem:[#allocation5 + $0x3c8] ss:$16 sps:$4 sm:$0xff]  }
  0xa2   : > { %1181 = vmatpush2.bf16.msra.mxu0 %v3279_v49  ;;  %v3372_v49 = vld [vmem:[#allocation5 + $0x3a8] ss:$16 sps:$4 sm:$0xff]  }
  0xa3   : > { %1222 = vmatpush2.bf16.msra.mxu1 %v3280_v50  ;;  %1182 = vmatprep.subr.bf16.mxu0 %v3281_v52  ;;  %v3377_v50 = vld [vmem:[#allocation5 + $0x18c] ss:$16 sps:$4 sm:$0xff]   ;;  %v3375_v52 = vld [vmem:[#allocation5 + $0x188] ss:$16 sps:$4 sm:$0xff]  }
  0xa4   : > { %1223 = vmatprep.subr.bf16.mxu1 %v3283_v53  ;;  %v3378_v53 = vld [vmem:[#allocation5 + $0x388] ss:$16 sps:$4 sm:$0xff]  }
  0xa6   : > { %1183 = vmatpush2.bf16.msra.mxu0 %v3285_v54  ;;  %v3383_v54 = vld [vmem:[#allocation5 + $0x16c] ss:$16 sps:$4 sm:$0xff]  }
  0xa7   : > { %1224 = vmatpush2.bf16.msra.mxu1 %v3286_v55  ;;  %1184 = vmatprep.subr.bf16.mxu0 %v3287_v56  ;;  %v3386_v55 = vld [vmem:[#allocation5 + $0x36c] ss:$16 sps:$4 sm:$0xff]   ;;  %v3381_v56 = vld [vmem:[#allocation5 + $0x168] ss:$16 sps:$4 sm:$0xff]  }
  0xa8   : > { %1225 = vmatprep.subr.bf16.mxu1 %v3289_v57  ;;  %v3384_v57 = vld [vmem:[#allocation5 + $0x368] ss:$16 sps:$4 sm:$0xff]  }
  0xaa   : > { %1185 = vmatpush2.bf16.msra.mxu0 %v3291_v58  ;;  %v3389_v58 = vld [vmem:[#allocation5 + $0x14c] ss:$16 sps:$4 sm:$0xff]  }
  0xab   : > { %1226 = vmatpush2.bf16.msra.mxu1 %v3292_v59  ;;  %1186 = vmatprep.subr.bf16.mxu0 %v3293_v60  ;;  %v3392_v59 = vld [vmem:[#allocation5 + $0x34c] ss:$16 sps:$4 sm:$0xff]   ;;  %v3387_v60 = vld [vmem:[#allocation5 + $0x148] ss:$16 sps:$4 sm:$0xff]  }
  0xac   : > { %1227 = vmatprep.subr.bf16.mxu1 %v3295_v61  ;;  %v3390_v61 = vld [vmem:[#allocation5 + $0x348] ss:$16 sps:$4 sm:$0xff]  }
  0xae   : > { %1187 = vmatpush2.bf16.msra.mxu0 %v3297_v62  ;;  %v3395_v62 = vld [vmem:[#allocation5 + $0x12c] ss:$16 sps:$4 sm:$0xff]  }
  0xaf   : > { %1228 = vmatpush2.bf16.msra.mxu1 %v3298_v63  ;;  %1188 = vmatprep.subr.bf16.mxu0 %v3299_v0  ;;  %v3398_v63 = vld [vmem:[#allocation5 + $0x32c] ss:$16 sps:$4 sm:$0xff]   ;;  %v3393_v0 = vld [vmem:[#allocation5 + $0x128] ss:$16 sps:$4 sm:$0xff]  }
  0xb0   : > { %1229 = vmatprep.subr.bf16.mxu1 %v3301_v1  ;;  %v3396_v1 = vld [vmem:[#allocation5 + $0x328] ss:$16 sps:$4 sm:$0xff]  }
  0xb2   : > { %1189 = vmatpush2.bf16.msra.mxu0 %v3303_v2  ;;  %v3401_v2 = vld [vmem:[#allocation5 + $0x10c] ss:$16 sps:$4 sm:$0xff]  }
  0xb3   : > { %1230 = vmatpush2.bf16.msra.mxu1 %v3304_v3  ;;  %1240 = vmatprep.subr.bf16.mxu0 %v3311_v4  ;;  %v3404_v3 = vld [vmem:[#allocation5 + $0x30c] ss:$16 sps:$4 sm:$0xff]   ;;  %v3399_v4 = vld [vmem:[#allocation5 + $0x108] ss:$16 sps:$4 sm:$0xff]  }
  0xb4   : > { %1281 = vmatprep.subr.bf16.mxu1 %v3314_v5  ;;  %v3402_v5 = vld [vmem:[#allocation5 + $0x308] ss:$16 sps:$4 sm:$0xff]  }
  0xb5   : > { %1191 = vmatmul.mubr.bf16.vlgmr.msra.gmra.mxu0 %v4060_v6 }
  0xb6   : > { %1232 = vmatmul.mubr.bf16.vlgmr.msra.gmra.mxu1 %v4062_v7  ;;  %1241 = vmatpush1.bf16.msra.mxu0 %v3309_v8  ;;  %v3407_v8 = vld [vmem:[#allocation8 + $0xe4] ss:$16 sps:$4 sm:$0xff]  }
  0xb7   : > { %1282 = vmatpush1.bf16.msra.mxu1 %v3312_v9  ;;  %1242 = vmatprep.subr.bf16.mxu0 %v3317_v10  ;;  %v3405_v9 = vld [vmem:[#allocation8 + $0xe0] ss:$16 sps:$4 sm:$0xff]   ;;  %v3410_v10 = vld [vmem:[#allocation8 + $0xc4] ss:$16 sps:$4 sm:$0xff]  }
  0xb8   : > { %1283 = vmatprep.subr.bf16.mxu1 %v3320_v11  ;;  %1272 = vmatprep.mubr.bf16.mxu0 %v4056_v47  ;;  %v3374_v47 = vld [vmem:[#allocation5 + $0x3ac] ss:$16 sps:$4 sm:$0xff]   ;;  %v3408_v11 = vld [vmem:[#allocation8 + $0xc0] ss:$16 sps:$4 sm:$0xff]  }
  0xb9   : > { %1313 = vmatprep.mubr.bf16.mxu1 %v2779_v51  ;;  %v3380_v51 = vld [vmem:[#allocation5 + $0x38c] ss:$16 sps:$4 sm:$0xff]  }
  0xba   : > { %1243 = vmatpush1.bf16.msra.mxu0 %v3315_v12  ;;  %v3413_v12 = vld [vmem:[#allocation8 + $0xa4] ss:$16 sps:$4 sm:$0xff]  }
  0xbb   : > { %1284 = vmatpush1.bf16.msra.mxu1 %v3318_v13  ;;  %1244 = vmatprep.subr.bf16.mxu0 %v3323_v14  ;;  %v3411_v13 = vld [vmem:[#allocation8 + $0xa0] ss:$16 sps:$4 sm:$0xff]   ;;  %v3416_v14 = vld [vmem:[#allocation8 + $0x84] ss:$16 sps:$4 sm:$0xff]  }
  0xbc   : > { %1285 = vmatprep.subr.bf16.mxu1 %v3326_v15  ;;  %v3414_v15 = vld [vmem:[#allocation8 + $0x80] ss:$16 sps:$4 sm:$0xff]  }
  0xbe   : > { %1245 = vmatpush1.bf16.msra.mxu0 %v3321_v16  ;;  %v3455_v16 = vld [vmem:[#allocation8 + $0x2e4] ss:$16 sps:$4 sm:$0xff]  }
  0xbf   : > { %1286 = vmatpush1.bf16.msra.mxu1 %v3324_v17  ;;  %1246 = vmatprep.subr.bf16.mxu0 %v3329_v18  ;;  %v3419_v17 = vld [vmem:[#allocation8 + $0x64] ss:$16 sps:$4 sm:$0xff]   ;;  %v3453_v18 = vld [vmem:[#allocation8 + $0x2e0] ss:$16 sps:$4 sm:$0xff]  }
  0xc0   : > { %1287 = vmatprep.subr.bf16.mxu1 %v3332_v19  ;;  %v3459_v19 = vld [vmem:[#allocation8 + $0x2c0] ss:$16 sps:$4 sm:$0xff]  }
  0xc2   : > { %1247 = vmatpush1.bf16.msra.mxu0 %v3327_v20  ;;  %v3422_v20 = vld [vmem:[#allocation8 + $0x44] ss:$16 sps:$4 sm:$0xff]  }
  0xc3   : > { %1288 = vmatpush1.bf16.msra.mxu1 %v3330_v21  ;;  %1248 = vmatprep.subr.bf16.mxu0 %v3335_v22  ;;  %v3420_v21 = vld [vmem:[#allocation8 + $0x40] ss:$16 sps:$4 sm:$0xff]  }
  0xc4   : > { %1289 = vmatprep.subr.bf16.mxu1 %v3338_v23  ;;  %v3465_v22 = vld [vmem:[#allocation8 + $0x2a0] ss:$16 sps:$4 sm:$0xff]   ;;  %v3467_v23 = vld [vmem:[#allocation8 + $0x2a4] ss:$16 sps:$4 sm:$0xff]  }
  0xc6   : > { %1249 = vmatpush1.bf16.msra.mxu0 %v3333_v24  ;;  %v3425_v24 = vld [vmem:[#allocation8 + $0x24] ss:$16 sps:$4 sm:$0xff]  }
  0xc7   : > { %1290 = vmatpush1.bf16.msra.mxu1 %v3336_v25  ;;  %1250 = vmatprep.subr.bf16.mxu0 %v3341_v26  ;;  %v3423_v25 = vld [vmem:[#allocation8 + $0x20] ss:$16 sps:$4 sm:$0xff]  }
  0xc8   : > { %1291 = vmatprep.subr.bf16.mxu1 %v3344_v27  ;;  %v3471_v26 = vld [vmem:[#allocation8 + $0x280] ss:$16 sps:$4 sm:$0xff]   ;;  %v3473_v27 = vld [vmem:[#allocation8 + $0x284] ss:$16 sps:$4 sm:$0xff]  }
  0xca   : > { %1251 = vmatpush1.bf16.msra.mxu0 %v3339_v28  ;;  %v3428_v28 = vld [vmem:[#allocation8 + $0x4] ss:$16 sps:$4 sm:$0xff]  }
  0xcb   : > { %1292 = vmatpush1.bf16.msra.mxu1 %v3342_v29  ;;  %1252 = vmatprep.subr.bf16.mxu0 %v3347_v30  ;;  %v3426_v29 = vld [vmem:[#allocation8] ss:$16 sps:$4 sm:$0xff]  }
  0xcc   : > { %1293 = vmatprep.subr.bf16.mxu1 %v3350_v31  ;;  %v3477_v30 = vld [vmem:[#allocation8 + $0x260] ss:$16 sps:$4 sm:$0xff]   ;;  %v3479_v31 = vld [vmem:[#allocation8 + $0x264] ss:$16 sps:$4 sm:$0xff]  }
  0xce   : > { %1253 = vmatpush1.bf16.msra.mxu0 %v3345_v32  ;;  %v3431_v32 = vld [vmem:[#allocation8 + $0x1e4] ss:$16 sps:$4 sm:$0xff]  }
  0xcf   : > { %1294 = vmatpush1.bf16.msra.mxu1 %v3348_v33  ;;  %1254 = vmatprep.subr.bf16.mxu0 %v3353_v34  ;;  %v3429_v33 = vld [vmem:[#allocation8 + $0x1e0] ss:$16 sps:$4 sm:$0xff]  }
  0xd0   : > { %1295 = vmatprep.subr.bf16.mxu1 %v3356_v35  ;;  %v3483_v34 = vld [vmem:[#allocation8 + $0x240] ss:$16 sps:$4 sm:$0xff]   ;;  %v3485_v35 = vld [vmem:[#allocation8 + $0x244] ss:$16 sps:$4 sm:$0xff]  }
  0xd2   : > { %1255 = vmatpush1.bf16.msra.mxu0 %v3351_v36  ;;  %v3434_v36 = vld [vmem:[#allocation8 + $0x1c4] ss:$16 sps:$4 sm:$0xff]  }
  0xd3   : > { %1296 = vmatpush1.bf16.msra.mxu1 %v3354_v37  ;;  %1256 = vmatprep.subr.bf16.mxu0 %v3359_v38  ;;  %v3432_v37 = vld [vmem:[#allocation8 + $0x1c0] ss:$16 sps:$4 sm:$0xff]  }
  0xd4   : > { %1297 = vmatprep.subr.bf16.mxu1 %v3362_v39  ;;  %v3489_v38 = vld [vmem:[#allocation8 + $0x220] ss:$16 sps:$4 sm:$0xff]   ;;  %v3491_v39 = vld [vmem:[#allocation8 + $0x224] ss:$16 sps:$4 sm:$0xff]  }
  0xd6   : > { %1257 = vmatpush2.bf16.msra.mxu0 %v3357_v40  ;;  %v3437_v40 = vld [vmem:[#allocation8 + $0x1a4] ss:$16 sps:$4 sm:$0xff]  }
  0xd7   : > { %1298 = vmatpush2.bf16.msra.mxu1 %v3360_v41  ;;  %1258 = vmatprep.subr.bf16.mxu0 %v3365_v42  ;;  %v3435_v41 = vld [vmem:[#allocation8 + $0x1a0] ss:$16 sps:$4 sm:$0xff]  }
  0xd8   : > { %1299 = vmatprep.subr.bf16.mxu1 %v3368_v43  ;;  %v3495_v42 = vld [vmem:[#allocation8 + $0x200] ss:$16 sps:$4 sm:$0xff]   ;;  %v3497_v43 = vld [vmem:[#allocation8 + $0x204] ss:$16 sps:$4 sm:$0xff]  }
  0xda   : > { %1259 = vmatpush2.bf16.msra.mxu0 %v3363_v44  ;;  %v3440_v44 = vld [vmem:[#allocation8 + $0x184] ss:$16 sps:$4 sm:$0xff]  }
  0xdb   : > { %1300 = vmatpush2.bf16.msra.mxu1 %v3366_v45  ;;  %1260 = vmatprep.subr.bf16.mxu0 %v3371_v46  ;;  %v3438_v45 = vld [vmem:[#allocation8 + $0x180] ss:$16 sps:$4 sm:$0xff]  }
  0xdc   : > { %1301 = vmatprep.subr.bf16.mxu1 %v3374_v47  ;;  %v3501_v46 = vld [vmem:[#allocation8 + $0x3e0] ss:$16 sps:$4 sm:$0xff]   ;;  %v3503_v47 = vld [vmem:[#allocation8 + $0x3e4] ss:$16 sps:$4 sm:$0xff]  }
  0xde   : > { %1261 = vmatpush2.bf16.msra.mxu0 %v3369_v48  ;;  %v3443_v48 = vld [vmem:[#allocation8 + $0x164] ss:$16 sps:$4 sm:$0xff]  }
  0xdf   : > { %1302 = vmatpush2.bf16.msra.mxu1 %v3372_v49  ;;  %1262 = vmatprep.subr.bf16.mxu0 %v3377_v50  ;;  %v3441_v49 = vld [vmem:[#allocation8 + $0x160] ss:$16 sps:$4 sm:$0xff]  }
  0xe0   : > { %1303 = vmatprep.subr.bf16.mxu1 %v3380_v51  ;;  %v3507_v50 = vld [vmem:[#allocation8 + $0x3c0] ss:$16 sps:$4 sm:$0xff]   ;;  %v3509_v51 = vld [vmem:[#allocation8 + $0x3c4] ss:$16 sps:$4 sm:$0xff]  }
  0xe2   : > { %1263 = vmatpush2.bf16.msra.mxu0 %v3375_v52  ;;  %v3446_v52 = vld [vmem:[#allocation8 + $0x144] ss:$16 sps:$4 sm:$0xff]  }
  0xe3   : > { %1304 = vmatpush2.bf16.msra.mxu1 %v3378_v53  ;;  %1264 = vmatprep.subr.bf16.mxu0 %v3383_v54  ;;  %v3444_v53 = vld [vmem:[#allocation8 + $0x140] ss:$16 sps:$4 sm:$0xff]  }
  0xe4   : > { %1305 = vmatprep.subr.bf16.mxu1 %v3386_v55  ;;  %v3513_v54 = vld [vmem:[#allocation8 + $0x3a0] ss:$16 sps:$4 sm:$0xff]   ;;  %v3515_v55 = vld [vmem:[#allocation8 + $0x3a4] ss:$16 sps:$4 sm:$0xff]  }
  0xe6   : > { %1265 = vmatpush2.bf16.msra.mxu0 %v3381_v56  ;;  %v3449_v56 = vld [vmem:[#allocation8 + $0x124] ss:$16 sps:$4 sm:$0xff]  }
  0xe7   : > { %1306 = vmatpush2.bf16.msra.mxu1 %v3384_v57  ;;  %1266 = vmatprep.subr.bf16.mxu0 %v3389_v58  ;;  %v3447_v57 = vld [vmem:[#allocation8 + $0x120] ss:$16 sps:$4 sm:$0xff]  }
  0xe8   : > { %1307 = vmatprep.subr.bf16.mxu1 %v3392_v59  ;;  %v3519_v58 = vld [vmem:[#allocation8 + $0x380] ss:$16 sps:$4 sm:$0xff]   ;;  %v3521_v59 = vld [vmem:[#allocation8 + $0x384] ss:$16 sps:$4 sm:$0xff]  }
  0xea   : > { %1267 = vmatpush2.bf16.msra.mxu0 %v3387_v60  ;;  %v3452_v60 = vld [vmem:[#allocation8 + $0x104] ss:$16 sps:$4 sm:$0xff]  }
  0xeb   : > { %1308 = vmatpush2.bf16.msra.mxu1 %v3390_v61  ;;  %1268 = vmatprep.subr.bf16.mxu0 %v3395_v62  ;;  %v3450_v61 = vld [vmem:[#allocation8 + $0x100] ss:$16 sps:$4 sm:$0xff]  }
  0xec   : > { %1309 = vmatprep.subr.bf16.mxu1 %v3398_v63  ;;  %v3525_v62 = vld [vmem:[#allocation8 + $0x360] ss:$16 sps:$4 sm:$0xff]   ;;  %v3527_v63 = vld [vmem:[#allocation8 + $0x364] ss:$16 sps:$4 sm:$0xff]  }
  0xee   : > { %1269 = vmatpush2.bf16.msra.mxu0 %v3393_v0  ;;  %v3458_v0 = vld [vmem:[#allocation8 + $0xec] ss:$16 sps:$4 sm:$0xff]  }
  0xef   : > { %1310 = vmatpush2.bf16.msra.mxu1 %v3396_v1  ;;  %1270 = vmatprep.subr.bf16.mxu0 %v3401_v2  ;;  %v3531_v1 = vld [vmem:[#allocation8 + $0x340] ss:$16 sps:$4 sm:$0xff]   ;;  %v3533_v2 = vld [vmem:[#allocation8 + $0x344] ss:$16 sps:$4 sm:$0xff]  }
  0xf0   : > { %1311 = vmatprep.subr.bf16.mxu1 %v3404_v3  ;;  %v3539_v3 = vld [vmem:[#allocation8 + $0x324] ss:$16 sps:$4 sm:$0xff]  }
  0xf2   : > { %1271 = vmatpush2.bf16.msra.mxu0 %v3399_v4  ;;  %v3537_v4 = vld [vmem:[#allocation8 + $0x320] ss:$16 sps:$4 sm:$0xff]  }
  0xf3   : > { %1312 = vmatpush2.bf16.msra.mxu1 %v3402_v5  ;;  %2120 = vmatprep.subr.bf16.mxu0 %v3407_v8  ;;  %v3545_v5 = vld [vmem:[#allocation8 + $0x304] ss:$16 sps:$4 sm:$0xff]   ;;  %v3543_v8 = vld [vmem:[#allocation8 + $0x300] ss:$16 sps:$4 sm:$0xff]  }
  0xf4   : > { %2161 = vmatprep.subr.bf16.mxu1 %v3455_v16 }
  0xf5   : > { %1273 = vmatmul.mubr.bf16.vlgmr.msra.gmra.mxu0 %v4060_v6  ;;  %v3417_v6 = vld [vmem:[#allocation8 + $0x60] ss:$16 sps:$4 sm:$0xff]  }
  0xf6   : > { %1314 = vmatmul.mubr.bf16.vlgmr.msra.gmra.mxu1 %v4062_v7  ;;  %2121 = vmatpush1.bf16.msra.mxu0 %v3405_v9  ;;  %v3461_v7 = vld [vmem:[#allocation8 + $0x2c4] ss:$16 sps:$4 sm:$0xff]   ;;  %v3551_v9 = vld [vmem:[#allocation8 + $0x2ec] ss:$16 sps:$4 sm:$0xff]  }
  0xf7   : > { %2122 = vmatprep.subr.bf16.mxu0 %v3410_v10  ;;  %2162 = vmatpush1.bf16.msra.mxu1 %v3453_v18  ;;  %v484_v10 = vlaneseq }
  0xf8   : > { %2163 = vmatprep.subr.bf16.mxu1 %v3461_v7 }
  0xfa   : > { %2123 = vmatpush1.bf16.msra.mxu0 %v3408_v11  ;;  %v4069_v11 = vshrl.u32 %v484_v10, 7 }
  0xfb   : > { %2124 = vmatprep.subr.bf16.mxu0 %v3413_v12  ;;  %2164 = vmatpush1.bf16.msra.mxu1 %v3459_v19 }
  0xfc   : > { %2165 = vmatprep.subr.bf16.mxu1 %v3467_v23  ;;  %v486_v12 = vsub.s32 0, %v4069_v11 }
  0xfe   : > { %2125 = vmatpush1.bf16.msra.mxu0 %v3411_v13  ;;  %v4072_v13 = vld [vmem:[#allocation7] sm:$0xf] }
  0xff   : > { %2126 = vmatprep.subr.bf16.mxu0 %v3416_v14  ;;  %2166 = vmatpush1.bf16.msra.mxu1 %v3465_v22  ;;  %v490_v14 = vsub.s32 1, %v4069_v11 }
 0x100   : > { %2167 = vmatprep.subr.bf16.mxu1 %v3473_v27 }
 0x101   : > { %v491_v16 = vrot.slane %v4072_v13, %v490_v14 }
 0x102   : > { %2127 = vmatpush1.bf16.msra.mxu0 %v3414_v15  ;;  %v487_v15 = vrot.slane %v4072_v13, %v486_v12 }
 0x103   : > { %2128 = vmatprep.subr.bf16.mxu0 %v3419_v17  ;;  %2168 = vmatpush1.bf16.msra.mxu1 %v3471_v26 }
 0x104   : > { %2169 = vmatprep.subr.bf16.mxu1 %v3479_v31 }
 0x106   : > { %2129 = vmatpush1.bf16.msra.mxu0 %v3417_v6 }
 0x107   : > { %2130 = vmatprep.subr.bf16.mxu0 %v3422_v20  ;;  %2170 = vmatpush1.bf16.msra.mxu1 %v3477_v30  ;;  %v3456_v30 = vld [vmem:[#allocation8 + $0xe8] ss:$16 sps:$4 sm:$0xff]  }
 0x108   : > { %2171 = vmatprep.subr.bf16.mxu1 %v3485_v35  ;;  %v3468_v35 = vld [vmem:[#allocation8 + $0xa8] ss:$16 sps:$4 sm:$0xff]  }
 0x10a   : > { %2131 = vmatpush1.bf16.msra.mxu0 %v3420_v21 }
 0x10b   : > { %2132 = vmatprep.subr.bf16.mxu0 %v3425_v24  ;;  %2172 = vmatpush1.bf16.msra.mxu1 %v3483_v34  ;;  %v3470_v34 = vld [vmem:[#allocation8 + $0xac] ss:$16 sps:$4 sm:$0xff]  }
 0x10c   : > { %2173 = vmatprep.subr.bf16.mxu1 %v3491_v39  ;;  %v3480_v39 = vld [vmem:[#allocation8 + $0x68] ss:$16 sps:$4 sm:$0xff]  }
 0x10e   : > { %2133 = vmatpush1.bf16.msra.mxu0 %v3423_v25 }
 0x10f   : > { %2134 = vmatprep.subr.bf16.mxu0 %v3428_v28  ;;  %2174 = vmatpush1.bf16.msra.mxu1 %v3489_v38  ;;  %v3482_v38 = vld [vmem:[#allocation8 + $0x6c] ss:$16 sps:$4 sm:$0xff]  }
 0x110   : > { %2175 = vmatprep.subr.bf16.mxu1 %v3497_v43  ;;  %v3492_v43 = vld [vmem:[#allocation8 + $0x28] ss:$16 sps:$4 sm:$0xff]  }
 0x112   : > { %2135 = vmatpush1.bf16.msra.mxu0 %v3426_v29 }
 0x113   : > { %2136 = vmatprep.subr.bf16.mxu0 %v3431_v32  ;;  %2176 = vmatpush1.bf16.msra.mxu1 %v3495_v42  ;;  %v3464_v32 = vld [vmem:[#allocation8 + $0xcc] ss:$16 sps:$4 sm:$0xff]  }
 0x114   : > { %2177 = vmatprep.subr.bf16.mxu1 %v3503_v47  ;;  %v3494_v42 = vld [vmem:[#allocation8 + $0x2c] ss:$16 sps:$4 sm:$0xff]   ;;  %v3504_v47 = vld [vmem:[#allocation8 + $0x1e8] ss:$16 sps:$4 sm:$0xff]  }
 0x116   : > { %2137 = vmatpush2.bf16.msra.mxu0 %v3429_v33  ;;  %v3462_v33 = vld [vmem:[#allocation8 + $0xc8] ss:$16 sps:$4 sm:$0xff]  }
 0x117   : > { %2138 = vmatprep.subr.bf16.mxu0 %v3434_v36  ;;  %2178 = vmatpush2.bf16.msra.mxu1 %v3501_v46  ;;  %v3476_v36 = vld [vmem:[#allocation8 + $0x8c] ss:$16 sps:$4 sm:$0xff]  }
 0x118   : > { %2179 = vmatprep.subr.bf16.mxu1 %v3509_v51  ;;  %v3506_v46 = vld [vmem:[#allocation8 + $0x1ec] ss:$16 sps:$4 sm:$0xff]   ;;  %v3516_v51 = vld [vmem:[#allocation8 + $0x1a8] ss:$16 sps:$4 sm:$0xff]  }
 0x11a   : > { %2139 = vmatpush2.bf16.msra.mxu0 %v3432_v37  ;;  %v3474_v37 = vld [vmem:[#allocation8 + $0x88] ss:$16 sps:$4 sm:$0xff]  }
 0x11b   : > { %2140 = vmatprep.subr.bf16.mxu0 %v3437_v40  ;;  %2180 = vmatpush2.bf16.msra.mxu1 %v3507_v50  ;;  %v3488_v40 = vld [vmem:[#allocation8 + $0x4c] ss:$16 sps:$4 sm:$0xff]  }
 0x11c   : > { %2181 = vmatprep.subr.bf16.mxu1 %v3515_v55  ;;  %v3518_v50 = vld [vmem:[#allocation8 + $0x1ac] ss:$16 sps:$4 sm:$0xff]   ;;  %v3528_v55 = vld [vmem:[#allocation8 + $0x168] ss:$16 sps:$4 sm:$0xff]  }
 0x11e   : > { %2141 = vmatpush2.bf16.msra.mxu0 %v3435_v41  ;;  %v3486_v41 = vld [vmem:[#allocation8 + $0x48] ss:$16 sps:$4 sm:$0xff]  }
 0x11f   : > { %2142 = vmatprep.subr.bf16.mxu0 %v3440_v44  ;;  %2182 = vmatpush2.bf16.msra.mxu1 %v3513_v54  ;;  %v3500_v44 = vld [vmem:[#allocation8 + $0xc] ss:$16 sps:$4 sm:$0xff]  }
 0x120   : > { %2183 = vmatprep.subr.bf16.mxu1 %v3521_v59  ;;  %v3530_v54 = vld [vmem:[#allocation8 + $0x16c] ss:$16 sps:$4 sm:$0xff]   ;;  %v3534_v59 = vld [vmem:[#allocation8 + $0x148] ss:$16 sps:$4 sm:$0xff]  }
 0x122   : > { %2143 = vmatpush2.bf16.msra.mxu0 %v3438_v45  ;;  %v3498_v45 = vld [vmem:[#allocation8 + $0x8] ss:$16 sps:$4 sm:$0xff]  }
 0x123   : > { %2144 = vmatprep.subr.bf16.mxu0 %v3443_v48  ;;  %2184 = vmatpush2.bf16.msra.mxu1 %v3519_v58  ;;  %v3512_v48 = vld [vmem:[#allocation8 + $0x1cc] ss:$16 sps:$4 sm:$0xff]   ;;  %v498_v58 = vsub.s32 3, %v4069_v11 }
 0x124   : > { %2185 = vmatprep.subr.bf16.mxu1 %v3527_v63 }
 0x126   : > { %2145 = vmatpush2.bf16.msra.mxu0 %v3441_v49  ;;  %v3510_v49 = vld [vmem:[#allocation8 + $0x1c8] ss:$16 sps:$4 sm:$0xff]  }
 0x127   : > { %2146 = vmatprep.subr.bf16.mxu0 %v3446_v52  ;;  %2186 = vmatpush2.bf16.msra.mxu1 %v3525_v62  ;;  %v3524_v52 = vld [vmem:[#allocation8 + $0x18c] ss:$16 sps:$4 sm:$0xff]   ;;  %v499_v62 = vrot.slane %v4072_v13, %v498_v58 }
 0x128   : > { %2187 = vmatprep.subr.bf16.mxu1 %v3533_v2  ;;  %v3540_v2 = vld [vmem:[#allocation8 + $0x128] ss:$16 sps:$4 sm:$0xff]  }
 0x12a   : > { %2147 = vmatpush2.bf16.msra.mxu0 %v3444_v53  ;;  %v3522_v53 = vld [vmem:[#allocation8 + $0x188] ss:$16 sps:$4 sm:$0xff]  }
 0x12b   : > { %2148 = vmatprep.subr.bf16.mxu0 %v3449_v56  ;;  %2188 = vmatpush2.bf16.msra.mxu1 %v3531_v1  ;;  %v494_v56 = vsub.s32 2, %v4069_v11 }
 0x12c   : > { %2189 = vmatprep.subr.bf16.mxu1 %v3539_v3 }
 0x12e   : > { %2149 = vmatpush2.bf16.msra.mxu0 %v3447_v57  ;;  %v3536_v57 = vld [vmem:[#allocation8 + $0x14c] ss:$16 sps:$4 sm:$0xff]  }
 0x12f   : > { %2150 = vmatprep.subr.bf16.mxu0 %v3452_v60  ;;  %2190 = vmatpush2.bf16.msra.mxu1 %v3537_v4  ;;  %v495_v60 = vrot.slane %v4072_v13, %v494_v56 }
 0x130   : > { %2191 = vmatprep.subr.bf16.mxu1 %v3545_v5  ;;  %v3548_v5 = vld [vmem:[#allocation8 + $0x10c] ss:$16 sps:$4 sm:$0xff]  }
 0x132   : > { %2151 = vmatpush2.bf16.msra.mxu0 %v3450_v61  ;;  %v3542_v61 = vld [vmem:[#allocation8 + $0x12c] ss:$16 sps:$4 sm:$0xff]  }
 0x133   : > { %2202 = vmatprep.subr.bf16.mxu0 %v3458_v0  ;;  %2192 = vmatpush2.bf16.msra.mxu1 %v3543_v8 }
 0x134   : > { %2243 = vmatprep.subr.bf16.mxu1 %v3551_v9 }
 0x175   : > { %v1192_v17 = vpop.f32.mrf.mxu0 }
 0x176   : > { %v1233_v18 = vpop.f32.mrf.mxu1  ;;  %v1193_v6 = vadd.f32 %v1192_v17, %v487_v15  ;;  %v3546_v17 = vld [vmem:[#allocation8 + $0x108] ss:$16 sps:$4 sm:$0xff]  }
 0x177   : > { %v1194_v19 = vpop.f32.mrf.mxu0 }
 0x178   : > { %v1235_v7 = vpop.f32.mrf.mxu1  ;;  %v1234_v20 = vadd.f32 %v1233_v18, %v1193_v6  ;;  %v1195_v21 = vadd.f32 %v1194_v19, %v491_v16 }
 0x179   : > { %v1196_v22 = vpop.f32.mrf.mxu0 }
 0x17a   : > { %v1237_v23 = vpop.f32.mrf.mxu1  ;;  %v1236_v24 = vadd.f32 %v1235_v7, %v1195_v21  ;;  %v1322_v25 = vmax.f32 %v1234_v20, 0.0  ;;  %v3549_v20 = vld [vmem:[#allocation8 + $0x2e8] ss:$16 sps:$4 sm:$0xff]   ;;  %v3554_v22 = vld [vmem:[#allocation8 + $0x2cc] ss:$16 sps:$4 sm:$0xff]  }
 0x17b   : > { %v1197_v26 = vpop.f32.mrf.mxu0  ;;  %v3552_v23 = vld [vmem:[#allocation8 + $0x2c8] ss:$16 sps:$4 sm:$0xff]  }
 0x17c   : > { %v1238_v27 = vpop.f32.mrf.mxu1  ;;  %v1323_v28 = vmax.f32 %v1236_v24, 0.0  ;;  %v4081_v31 = vpack.c.bf16 %v1322_v25, %v1322_v25  ;;  %v3557_v24 = vld [vmem:[#allocation8 + $0x2ac] ss:$16 sps:$4 sm:$0xff]   ;;  %v3555_v25 = vld [vmem:[#allocation8 + $0x2a8] ss:$16 sps:$4 sm:$0xff]  }
 0x17d   : > { %v3560_v26 = vld [vmem:[#allocation8 + $0x28c] ss:$16 sps:$4 sm:$0xff]  }
 0x17e   : > { %v1327_v29 = vpack.c.bf16 %v1323_v28, %v1323_v28  ;;  %v3597_v27 = vld [vmem:[#allocation10 + $0x78] sm:$0xff]  }
 0x17f   : > { %v3598_v28 = vld [vmem:[#allocation10 + $0x38] sm:$0xff]  }
 0x180   : > { %2152 = vmatprep.mubr.bf16.mxu0 %v1327_v29 }
 0x181   : > { %2153 = vmatmul.mubr.bf16.vlgmr.msra.gmra.mxu0 %v4081_v31 }
 0x182   : > { %2203 = vmatpush1.bf16.msra.mxu0 %v3456_v30  ;;  %2234 = vmatprep.mubr.bf16.mxu0 %v1327_v29  ;;  %v3599_v29 = vld [vmem:[#allocation10 + $0x70] sm:$0xff]   ;;  %v3558_v30 = vld [vmem:[#allocation8 + $0x288] ss:$16 sps:$4 sm:$0xff]  }
 0x183   : > { %2204 = vmatprep.subr.bf16.mxu0 %v3464_v32  ;;  %v3600_v32 = vld [vmem:[#allocation10 + $0x30] sm:$0xff]  }
 0x186   : > { %2205 = vmatpush1.bf16.msra.mxu0 %v3462_v33  ;;  %v3601_v33 = vld [vmem:[#allocation10 + $0x68] sm:$0xff]  }
 0x187   : > { %2206 = vmatprep.subr.bf16.mxu0 %v3470_v34  ;;  %v3561_v34 = vld [vmem:[#allocation8 + $0x268] ss:$16 sps:$4 sm:$0xff]  }
 0x18a   : > { %2207 = vmatpush1.bf16.msra.mxu0 %v3468_v35  ;;  %v3602_v35 = vld [vmem:[#allocation10 + $0x28] sm:$0xff]  }
 0x18b   : > { %2208 = vmatprep.subr.bf16.mxu0 %v3476_v36  ;;  %v3566_v36 = vld [vmem:[#allocation8 + $0x24c] ss:$16 sps:$4 sm:$0xff]  }
 0x18e   : > { %2209 = vmatpush1.bf16.msra.mxu0 %v3474_v37  ;;  %v3603_v37 = vld [vmem:[#allocation10 + $0x60] sm:$0xff]  }
 0x18f   : > { %2210 = vmatprep.subr.bf16.mxu0 %v3482_v38  ;;  %v3564_v38 = vld [vmem:[#allocation8 + $0x248] ss:$16 sps:$4 sm:$0xff]  }
 0x192   : > { %2211 = vmatpush1.bf16.msra.mxu0 %v3480_v39  ;;  %v3604_v39 = vld [vmem:[#allocation10 + $0x20] sm:$0xff]  }
 0x193   : > { %2212 = vmatprep.subr.bf16.mxu0 %v3488_v40  ;;  %v3569_v40 = vld [vmem:[#allocation8 + $0x22c] ss:$16 sps:$4 sm:$0xff]  }
 0x196   : > { %2213 = vmatpush1.bf16.msra.mxu0 %v3486_v41  ;;  %v3605_v41 = vld [vmem:[#allocation10 + $0x58] sm:$0xff]  }
 0x197   : > { %2214 = vmatprep.subr.bf16.mxu0 %v3494_v42  ;;  %v3567_v42 = vld [vmem:[#allocation8 + $0x228] ss:$16 sps:$4 sm:$0xff]  }
 0x19a   : > { %2215 = vmatpush1.bf16.msra.mxu0 %v3492_v43  ;;  %v3606_v43 = vld [vmem:[#allocation10 + $0x18] sm:$0xff]  }
 0x19b   : > { %2216 = vmatprep.subr.bf16.mxu0 %v3500_v44  ;;  %v3572_v44 = vld [vmem:[#allocation8 + $0x20c] ss:$16 sps:$4 sm:$0xff]  }
 0x19e   : > { %2217 = vmatpush1.bf16.msra.mxu0 %v3498_v45  ;;  %v3607_v45 = vld [vmem:[#allocation10 + $0x50] sm:$0xff]  }
 0x19f   : > { %2218 = vmatprep.subr.bf16.mxu0 %v3506_v46  ;;  %v3570_v46 = vld [vmem:[#allocation8 + $0x208] ss:$16 sps:$4 sm:$0xff]  }
 0x1a2   : > { %2219 = vmatpush2.bf16.msra.mxu0 %v3504_v47  ;;  %v3575_v47 = vld [vmem:[#allocation8 + $0x3ec] ss:$16 sps:$4 sm:$0xff]  }
 0x1a3   : > { %2220 = vmatprep.subr.bf16.mxu0 %v3512_v48  ;;  %v3573_v48 = vld [vmem:[#allocation8 + $0x3e8] ss:$16 sps:$4 sm:$0xff]  }
 0x1a6   : > { %2221 = vmatpush2.bf16.msra.mxu0 %v3510_v49  ;;  %v3578_v49 = vld [vmem:[#allocation8 + $0x3cc] ss:$16 sps:$4 sm:$0xff]  }
 0x1a7   : > { %2222 = vmatprep.subr.bf16.mxu0 %v3518_v50  ;;  %v3576_v50 = vld [vmem:[#allocation8 + $0x3c8] ss:$16 sps:$4 sm:$0xff]  }
 0x1aa   : > { %2223 = vmatpush2.bf16.msra.mxu0 %v3516_v51  ;;  %v3581_v51 = vld [vmem:[#allocation8 + $0x3ac] ss:$16 sps:$4 sm:$0xff]  }
 0x1ab   : > { %2224 = vmatprep.subr.bf16.mxu0 %v3524_v52  ;;  %v3579_v52 = vld [vmem:[#allocation8 + $0x3a8] ss:$16 sps:$4 sm:$0xff]  }
 0x1ae   : > { %2225 = vmatpush2.bf16.msra.mxu0 %v3522_v53  ;;  %v3584_v53 = vld [vmem:[#allocation8 + $0x38c] ss:$16 sps:$4 sm:$0xff]  }
 0x1af   : > { %2226 = vmatprep.subr.bf16.mxu0 %v3530_v54  ;;  %v3582_v54 = vld [vmem:[#allocation8 + $0x388] ss:$16 sps:$4 sm:$0xff]  }
 0x1b2   : > { %2227 = vmatpush2.bf16.msra.mxu0 %v3528_v55  ;;  %v3587_v55 = vld [vmem:[#allocation8 + $0x36c] ss:$16 sps:$4 sm:$0xff]  }
 0x1b3   : > { %2228 = vmatprep.subr.bf16.mxu0 %v3536_v57  ;;  %v3585_v57 = vld [vmem:[#allocation8 + $0x368] ss:$16 sps:$4 sm:$0xff]  }
 0x1b5   : > { %v1274_v63 = vpop.f32.mrf.mxu0 }
 0x1b6   : > { %v1315_v0 = vpop.f32.mrf.mxu1  ;;  %v1275_v1 = vadd.f32 %v1274_v63, %v495_v60  ;;  %2229 = vmatpush2.bf16.msra.mxu0 %v3534_v59  ;;  %v3590_v59 = vld [vmem:[#allocation8 + $0x34c] ss:$16 sps:$4 sm:$0xff]   ;;  %v3588_v60 = vld [vmem:[#allocation8 + $0x348] ss:$16 sps:$4 sm:$0xff]  }
 0x1b7   : > { %v1276_v3 = vpop.f32.mrf.mxu0  ;;  %2230 = vmatprep.subr.bf16.mxu0 %v3542_v61  ;;  %v3593_v61 = vld [vmem:[#allocation8 + $0x32c] ss:$16 sps:$4 sm:$0xff]  }
 0x1b8   : > { %v1317_v4 = vpop.f32.mrf.mxu1  ;;  %v1316_v8 = vadd.f32 %v1315_v0, %v1275_v1  ;;  %v1277_v9 = vadd.f32 %v1276_v3, %v499_v62  ;;  %v3591_v62 = vld [vmem:[#allocation8 + $0x328] ss:$16 sps:$4 sm:$0xff]   ;;  %v3596_v63 = vld [vmem:[#allocation8 + $0x30c] ss:$16 sps:$4 sm:$0xff]   ;;  %v3608_v1 = vld [vmem:[#allocation10 + $0x10] sm:$0xff]  }
 0x1b9   : > { %v1278_v10 = vpop.f32.mrf.mxu0  ;;  %v3594_v0 = vld [vmem:[#allocation8 + $0x308] ss:$16 sps:$4 sm:$0xff]  }
 0x1ba   : > { %v1319_v15 = vpop.f32.mrf.mxu1  ;;  %v1318_v16 = vadd.f32 %v1317_v4, %v1277_v9  ;;  %2231 = vmatpush2.bf16.msra.mxu0 %v3540_v2  ;;  %v1324_v18 = vmax.f32 %v1316_v8, 0.0  ;;  %v3609_v2 = vld [vmem:[#allocation10 + $0x48] sm:$0xff]   ;;  %v3611_v4 = vld [vmem:[#allocation10 + $0x40] sm:$0xff]   ;;  %v3613_v8 = vld [vmem:[#allocation10 + $0xf8] sm:$0xff]  }
 0x1bb   : > { %v1279_v6 = vpop.f32.mrf.mxu0  ;;  %2232 = vmatprep.subr.bf16.mxu0 %v3548_v5  ;;  %v3610_v3 = vld [vmem:[#allocation10 + $0x8] sm:$0xff]   ;;  %v3612_v5 = vld [vmem:[#allocation10] sm:$0xff]   ;;  %v3614_v9 = vld [vmem:[#allocation10 + $0xb8] sm:$0xff]  }
 0x1bc   : > { %v1320_v19 = vpop.f32.mrf.mxu1  ;;  %v1325_v13 = vmax.f32 %v1318_v16, 0.0  ;;  %v4092_v21 = vpack.c.bf16 %v1324_v18, %v1324_v18  ;;  %v3615_v10 = vld [vmem:[#allocation10 + $0xf0] sm:$0xff]   ;;  %v3617_v16 = vld [vmem:[#allocation10 + $0xe8] sm:$0xff]   ;;  %v3619_v18 = vld [vmem:[#allocation10 + $0xe0] sm:$0xff]  }
 0x1bd   : > { %v3616_v15 = vld [vmem:[#allocation10 + $0xb0] sm:$0xff]   ;;  %v3620_v6 = vld [vmem:[#allocation10 + $0xa0] sm:$0xff]   ;;  %v3621_v19 = vld [vmem:[#allocation10 + $0xd8] sm:$0xff]  }
 0x1be   : > { %v1329_v7 = vpack.c.bf16 %v1325_v13, %v1325_v13  ;;  %2233 = vmatpush2.bf16.msra.mxu0 %v3546_v17  ;;  %v3618_v17 = vld [vmem:[#allocation10 + $0xa8] sm:$0xff]   ;;  %v3622_v13 = vld [vmem:[#allocation10 + $0x98] sm:$0xff]  }
 0x1bf   : > { %3074 = vmatprep.subr.bf16.mxu0 %v3597_v27  ;;  %v3628_v27 = vld [vmem:[#allocation10 + $0x80] sm:$0xff]  }
 0x1c0   : > { %2193 = vmatprep.mubr.bf16.mxu1 %v1329_v7 }
 0x1c1   : > { %2235 = vmatmul.mubr.bf16.vlgmr.msra.gmra.mxu0 %v4081_v31  ;;  %2194 = vmatmul.mubr.bf16.vlgmr.msra.gmra.mxu1 %v4092_v21  ;;  %v3563_v31 = vld [vmem:[#allocation8 + $0x26c] ss:$16 sps:$4 sm:$0xff]  }
 0x1c2   : > { %2244 = vmatpush1.bf16.msra.mxu1 %v3549_v20  ;;  %2275 = vmatprep.mubr.bf16.mxu1 %v1329_v7  ;;  %v3623_v7 = vld [vmem:[#allocation10 + $0xd0] sm:$0xff]  }
 0x1c3   : > { %2245 = vmatprep.subr.bf16.mxu1 %v3554_v22  ;;  %3075 = vmatpush3.bf16.msra.mxu0 %v3598_v28  ;;  %v3624_v20 = vld [vmem:[#allocation10 + $0x90] sm:$0xff]   ;;  %v3625_v22 = vld [vmem:[#allocation10 + $0xc8] sm:$0xff]  }
 0x1c4   : > { %3076 = vmatprep.subr.bf16.mxu0 %v3599_v29  ;;  %v1458_v29 = vld [vmem:[%s4151_s4] sm:$0xf] }
 0x1c6   : > { %2246 = vmatpush1.bf16.msra.mxu1 %v3552_v23  ;;  %v3626_v23 = vld [vmem:[#allocation10 + $0x88] sm:$0xff]  }
 0x1c7   : > { %2247 = vmatprep.subr.bf16.mxu1 %v3557_v24  ;;  %3077 = vmatpush3.bf16.msra.mxu0 %v3600_v32  ;;  %v1467_v32 = vrot.slane %v1458_v29, %v490_v14  ;;  %v1475_v14 = vrot.slane %v1458_v29, %v498_v58 }
 0x1c8   : > { %3078 = vmatprep.subr.bf16.mxu0 %v3601_v33 }
 0x1ca   : > { %2248 = vmatpush1.bf16.msra.mxu1 %v3555_v25 }
 0x1cb   : > { %2249 = vmatprep.subr.bf16.mxu1 %v3560_v26  ;;  %3079 = vmatpush3.bf16.msra.mxu0 %v3602_v35  ;;  %v3627_v26 = vld [vmem:[#allocation10 + $0xc0] sm:$0xff]  }
 0x1cc   : > { %3080 = vmatprep.subr.bf16.mxu0 %v3603_v37 }
 0x1ce   : > { %2250 = vmatpush1.bf16.msra.mxu1 %v3558_v30  ;;  %v1463_v30 = vrot.slane %v1458_v29, %v486_v12  ;;  %v1471_v12 = vrot.slane %v1458_v29, %v494_v56 }
 0x1cf   : > { %2251 = vmatprep.subr.bf16.mxu1 %v3563_v31  ;;  %3081 = vmatpush3.bf16.msra.mxu0 %v3604_v39 }
 0x1d0   : > { %3082 = vmatprep.subr.bf16.mxu0 %v3605_v41 }
 0x1d2   : > { %2252 = vmatpush1.bf16.msra.mxu1 %v3561_v34 }
 0x1d3   : > { %2253 = vmatprep.subr.bf16.mxu1 %v3566_v36  ;;  %3083 = vmatpush3.bf16.msra.mxu0 %v3606_v43 }
 0x1d4   : > { %3084 = vmatprep.subr.bf16.mxu0 %v3607_v45 }
 0x1d6   : > { %2254 = vmatpush1.bf16.msra.mxu1 %v3564_v38 }
 0x1d7   : > { %2255 = vmatprep.subr.bf16.mxu1 %v3569_v40  ;;  %3085 = vmatpush3.bf16.msra.mxu0 %v3608_v1 }
 0x1d8   : > { %3086 = vmatprep.subr.bf16.mxu0 %v3609_v2 }
 0x1da   : > { %2256 = vmatpush1.bf16.msra.mxu1 %v3567_v42 }
 0x1db   : > { %2257 = vmatprep.subr.bf16.mxu1 %v3572_v44  ;;  %3087 = vmatpush3.bf16.msra.mxu0 %v3610_v3 }
 0x1dc   : > { %3088 = vmatprep.subr.bf16.mxu0 %v3611_v4 }
 0x1de   : > { %2258 = vmatpush1.bf16.msra.mxu1 %v3570_v46 }
 0x1df   : > { %2259 = vmatprep.subr.bf16.mxu1 %v3575_v47  ;;  %3089 = vmatpush3.bf16.msra.mxu0 %v3612_v5 }
 0x1e2   : > { %2260 = vmatpush2.bf16.msra.mxu1 %v3573_v48 }
 0x1e3   : > { %2261 = vmatprep.subr.bf16.mxu1 %v3578_v49 }
 0x1e6   : > { %2262 = vmatpush2.bf16.msra.mxu1 %v3576_v50 }
 0x1e7   : > { %2263 = vmatprep.subr.bf16.mxu1 %v3581_v51 }
 0x1ea   : > { %2264 = vmatpush2.bf16.msra.mxu1 %v3579_v52 }
 0x1eb   : > { %2265 = vmatprep.subr.bf16.mxu1 %v3584_v53 }
 0x1ee   : > { %2266 = vmatpush2.bf16.msra.mxu1 %v3582_v54 }
 0x1ef   : > { %2267 = vmatprep.subr.bf16.mxu1 %v3587_v55 }
 0x1f2   : > { %2268 = vmatpush2.bf16.msra.mxu1 %v3585_v57 }
 0x1f3   : > { %2269 = vmatprep.subr.bf16.mxu1 %v3590_v59 }
 0x1f6   : > { %2270 = vmatpush2.bf16.msra.mxu1 %v3588_v60 }
 0x1f7   : > { %2271 = vmatprep.subr.bf16.mxu1 %v3593_v61 }
 0x1fa   : > { %2272 = vmatpush2.bf16.msra.mxu1 %v3591_v62 }
 0x1fb   : > { %2273 = vmatprep.subr.bf16.mxu1 %v3596_v63 }
 0x1fe   : > { %2274 = vmatpush2.bf16.msra.mxu1 %v3594_v0  ;;  %v3036_v0 = vld [vmem:[%s4153_s6] ss:$0 sm:$0xff] }
 0x1ff   : > { %3096 = vmatprep.subr.bf16.mxu1 %v3613_v8 }
 0x201   : > { %2276 = vmatmul.mubr.bf16.vlgmr.msra.gmra.mxu1 %v4092_v21 }
 0x202   : > { %3097 = vmatpush3.bf16.msra.mxu1 %v3614_v9 }
 0x203   : > { %3098 = vmatprep.subr.bf16.mxu1 %v3615_v10 }
 0x206   : > { %3099 = vmatpush3.bf16.msra.mxu1 %v3616_v15 }
 0x207   : > { %3100 = vmatprep.subr.bf16.mxu1 %v3617_v16 }
 0x20a   : > { %3101 = vmatpush3.bf16.msra.mxu1 %v3618_v17 }
 0x20b   : > { %3102 = vmatprep.subr.bf16.mxu1 %v3619_v18 }
 0x20e   : > { %3103 = vmatpush3.bf16.msra.mxu1 %v3620_v6 }
 0x20f   : > { %3104 = vmatprep.subr.bf16.mxu1 %v3621_v19 }
 0x212   : > { %3105 = vmatpush3.bf16.msra.mxu1 %v3622_v13 }
 0x213   : > { %3106 = vmatprep.subr.bf16.mxu1 %v3623_v7 }
 0x216   : > { %3107 = vmatpush3.bf16.msra.mxu1 %v3624_v20 }
 0x217   : > { %3108 = vmatprep.subr.bf16.mxu1 %v3625_v22 }
 0x21a   : > { %3109 = vmatpush3.bf16.msra.mxu1 %v3626_v23 }
 0x21b   : > { %3110 = vmatprep.subr.bf16.mxu1 %v3627_v26 }
 0x21e   : > { %3111 = vmatpush3.bf16.msra.mxu1 %v3628_v27 }
 0x241   : > { %v2154_v21 = vpop.f32.mrf.mxu0 }
 0x242   : > { %v2155_v31 = vadd.f32 %v2154_v21, %v1463_v30 }
 0x243   : > { %v2156_v24 = vpop.f32.mrf.mxu0 }
 0x244   : > { %v2157_v35 = vadd.f32 %v2156_v24, %v1467_v32 }
 0x245   : > { %v2158_v25 = vpop.f32.mrf.mxu0 }
 0x247   : > { %v2159_v28 = vpop.f32.mrf.mxu0 }
 0x281   : > { %v2236_v33 = vpop.f32.mrf.mxu0  ;;  %v2195_v34 = vpop.f32.mrf.mxu1 }
 0x282   : > { %v2196_v36 = vadd.f32 %v2195_v34, %v2155_v31  ;;  %v2237_v48 = vadd.f32 %v2236_v33, %v1471_v12 }
 0x283   : > { %v2238_v37 = vpop.f32.mrf.mxu0  ;;  %v2197_v38 = vpop.f32.mrf.mxu1 }
 0x284   : > { %v2198_v39 = vadd.f32 %v2197_v38, %v2157_v35  ;;  %v2284_v40 = vmax.f32 %v2196_v36, 0.0  ;;  %v2239_v50 = vadd.f32 %v2238_v37, %v1475_v14 }
 0x285   : > { %v2240_v41 = vpop.f32.mrf.mxu0  ;;  %v2199_v42 = vpop.f32.mrf.mxu1 }
 0x286   : > { %v2285_v43 = vmax.f32 %v2198_v39, 0.0  ;;  %v2288_v47 = vpack.c.bf16 %v2284_v40, %v2284_v40 }
 0x287   : > { %v2241_v44 = vpop.f32.mrf.mxu0  ;;  %v2200_v45 = vpop.f32.mrf.mxu1 }
 0x288   : > { %v2289_v46 = vpack.c.bf16 %v2285_v43, %v2285_v43 }
 0x28a   : > { %2587 = vmatprep.mubr.bf16.mxu0 %v2289_v46 }
 0x28b   : > { %2588 = vmatmul.mubr.bf16.vlgmr.msra.gmra.mxu0 %v2288_v47 }
 0x2c1   : > { %v2277_v49 = vpop.f32.mrf.mxu1 }
 0x2c2   : > { %v2278_v51 = vadd.f32 %v2277_v49, %v2237_v48 }
 0x2c3   : > { %v2279_v52 = vpop.f32.mrf.mxu1 }
 0x2c4   : > { %v2280_v53 = vadd.f32 %v2279_v52, %v2239_v50  ;;  %v2286_v54 = vmax.f32 %v2278_v51, 0.0 }
 0x2c5   : > { %v2281_v55 = vpop.f32.mrf.mxu1 }
 0x2c6   : > { %v2287_v57 = vmax.f32 %v2280_v53, 0.0  ;;  %v2290_v61 = vpack.c.bf16 %v2286_v54, %v2286_v54 }
 0x2c7   : > { %v2282_v59 = vpop.f32.mrf.mxu1 }
 0x2c8   : > { %v2291_v60 = vpack.c.bf16 %v2287_v57, %v2287_v57 }
 0x2ca   : > { %2627 = vmatprep.mubr.bf16.mxu1 %v2291_v60 }
 0x2cb   : > { %2628 = vmatmul.mubr.bf16.vlgmr.msra.gmra.mxu1 %v2290_v61 }
 0x34b   : > { %v3090_v56 = vpop.f32.mrf.mxu0 }
 0x34d   : > { %v3091_v62 = vpop.f32.mrf.mxu0 }
 0x34e   : > { %v3092_v63 = vadd.f32 %v3091_v62, %v3090_v56 }
 0x34f   : > { %v3093_v11 = vpop.f32.mrf.mxu0 }
 0x350   : > { %v2590_v3 = vadd.f32 %v3092_v63, %v3036_v0 }
 0x351   : > { %v3094_v58 = vpop.f32.mrf.mxu0 }
 0x38b   : > { %v3112_v1 = vpop.f32.mrf.mxu1 }
 0x38d   : > { %v3113_v2 = vpop.f32.mrf.mxu1 }
 0x38e   : > { %v3114_v4 = vadd.f32 %v3113_v2, %v3112_v1 }
 0x38f   : > { %v3115_v5 = vpop.f32.mrf.mxu1 }
 0x390   : > { %v2630_v8 = vadd.f32 %v3114_v4, %v2590_v3 }
 0x391   : > { %v3116_v9 = vpop.f32.mrf.mxu1 }
 0x392   : > { %v2635_v10 = vpack.c.bf16 %v2630_v8, %v2630_v8 }
 0x394   : > { %2636 = vst [vmem:[%s350_s18] sm:$0xf] %v2635_v10 }
 0x395   : > { %3774 = shalt.err (!%p3771_p11)
}
 0x396   : > { %s3775_s2 = scalar_lea.hbm %s2649_s11, 64  ;;  %s3779_s21 = scalar_lea.hbm %s4154_s7, 128 }
 0x397   : > { %p3776_p13 = scmp.ne.s32.totalorder %s2649_s11, %s3775_s2  ;;  %p3780_p4 = scmp.lt.s32.totalorder %s2649_s11, %s4154_s7 }
 0x398   : > { %p3781_p6 = scmp.lt.s32.totalorder %s3779_s21, %s3775_s2 }
 0x399   : > { %p3777_p1 = pnand %p3776_p13, %p4176_p7 }
 0x39a   : > { %p3782_p5 = por %p3781_p6, %p3780_p4 }
 0x39b   : > { %p3778_p3 = pneg %p3777_p1 }
 0x39d   : > { %p3783_p8 = pnand %p3782_p5, %p3778_p3 }
 0x39f   : > { %3786 = shalt.err (!%p3783_p8)
}
 0x3a0   : > { %3136 = dma.vmem_to_hbm [thread:$0]  (%p4176_p7), %s2652_s12, 64, %s2649_s11, %s2638_s22  }
 0x3a1 PF: > { %s2663_s16 = sand.u32 1, %s3821_s24   ;;  %p4177_p10 = scmp.ne.s32.totalorder %s4168_s28, 0 }
 0x3a2   : > { %p4178_p0 = scmp.ge.s32.totalorder %s3833_s27, 2  ;;  %s2664_s18 = scalar_lea.sflag [#allocation4], %s2663_s16 }
 0x3a4   : > { %p3156_p12 = pnand %p4178_p0, %p4177_p10 }
 0x3a6   : > { %p3157_p2 = pneg %p3156_p12 }
 0x3a8   : > { %3816 = dma.done.wait (%p3157_p2), %s2664_s18, 64  }
 0x3a9   : > { %3818 = vsyncadd (%p3157_p2), %s2664_s18, 4294967232  ;;  %p22_p9 = scmp.ge.s32.totalorder %s3974_s17, 4   ;;  %s4179_s24 = smov %s3825_s25 }
 0x3aa   : > { %s4180_s25 = smov %s3829_s26  ;;  %s4181_s26 = smov %s3985_s20 }
 0x3ab   : > { %s4182_s27 = smov %s3974_s17  ;;  %24 = sbr.rel (!%p22_p9) target bundleno = 10 (0xa), region = 109 }
 0x3b0   :  { %2669 = vsyncpa [#allocation3], 1 }
 0x3b1   :  { %2671 = vsyncpa [#allocation3 + $0x1], 1 }
 0x3b2   :  { %2672 = vsyncpa [#allocation6], 1 }
 0x3b3   :  { %2673 = vsyncpa [#allocation9], 1 }
 0x3b4   :  { %2674 = vsyncpa [#allocation4], 1 }
 0x3b5   :  { %2676 = vsyncpa [#allocation4 + $0x1], 1 }

</bundles_post_ra>
